<compile_context>
chip_gen: v6e
topology: v6e:2x2x1
jax: 0.10.0
libtpu: 0.0.40
codegen_flags: <defaults>
</compile_context>

<pallas_src>
import functools

import jax
import jax.numpy as jnp
import numpy as np
from jax import lax
from jax.experimental import pallas as pl
from jax.experimental.pallas import tpu as pltpu


def _round_up(x, m):
    return (x + m - 1) // m * m


def _conv_gn_kernel(x_ref, w_ref, b_ref, gnw_ref, gnb_ref, gmat_ref, maskw_ref,
                    out_ref, patch_ref, *, taps, cin, kkkc, use_gn, eps):
    """One batch element per grid step.

    x_ref    : (1, Cin, LP)        flattened padded input, bf16 (LP >= Dp*Hp*Wp)
    w_ref    : (Cout, KKKCpad)     im2col conv weight, bf16 (zero cols past KKKC)
    b_ref    : (Cout, 1)           conv bias, f32
    gnw_ref  : (Cout, 1)           GroupNorm gamma, f32
    gnb_ref  : (Cout, 1)           GroupNorm beta, f32
    gmat_ref : (Cout, Cout)        group-averaging matrix, f32
    maskw_ref: (1, NPcols)         valid-column mask / (Do*Ho*Wo), f32
    out_ref  : (1, Cout, NPcols)   f32 output, padded-stride column layout
    patch_ref: (KKKCpad, NPcols)   VMEM im2col scratch, bf16
    """
    kkkc_pad, npcols = patch_ref.shape

    # Zero the contraction padding rows (scratch VMEM is uninitialised; the
    # matching weight columns are zero, but 0 * NaN would still poison the MXU).
    if kkkc_pad > kkkc:
        patch_ref[kkkc:, :] = jnp.zeros((kkkc_pad - kkkc, npcols), patch_ref.dtype)

    # im2col: each tap is a static lane-offset window of the flattened padded
    # input (columns use padded strides) -> 27 plain (Cin x NPcols) copies.
    for t, off in enumerate(taps):
        patch_ref[t * cin:(t + 1) * cin, :] = x_ref[0, :, off:off + npcols]

    # One MXU matmul over the whole K^3*Cin contraction, f32 accumulation.
    y = jnp.dot(w_ref[...], patch_ref[...], preferred_element_type=jnp.float32)
    y = y + b_ref[...]                                          # (Cout, NPcols)

    if use_gn:
        mw = maskw_ref[...]                                     # mask / count
        mean_c = jnp.sum(y * mw, axis=1, keepdims=True)         # per-channel mean
        mean_g = jnp.dot(gmat_ref[...], mean_c,
                         preferred_element_type=jnp.float32)    # per-group mean
        diff = y - mean_g
        var_c = jnp.sum(diff * diff * mw, axis=1, keepdims=True)
        var_g = jnp.dot(gmat_ref[...], var_c,
                        preferred_element_type=jnp.float32)     # per-group biased var
        y = diff * lax.rsqrt(var_g + eps) * gnw_ref[...] + gnb_ref[...]

    out_ref[0] = y.astype(out_ref.dtype)


def horizontal_circular_conv3d(x_ncdhw, conv_w, conv_b, gn_w=None, gn_b=None,
                               residual=None, *, pad=1, gn=True, relu=True,
                               eps=1e-5, compute_dtype=jnp.bfloat16):
    """Forward pass matching the PyTorch module (stride=1, dilation=1).

    x_ncdhw : (N, Cin, D, H, W)     conv_w : (Cout, Cin, K, K, K)
    returns : (N, Cout, Do, Ho, Wo) float32
    """
    N, Cin, D, H, W = x_ncdhw.shape
    Cout, Cin_w, K, K2, K3 = conv_w.shape
    assert Cin_w == Cin and K2 == K and K3 == K

    Dp, Hp, Wp = D + 2 * pad, H + 2 * pad, W + 2 * pad
    Do, Ho, Wo = Dp - K + 1, Hp - K + 1, Wp - K + 1          # output extents
    count = Do * Ho * Wo
    HpWp = Hp * Wp

    # Column layout: conv outputs are computed at flat positions
    # p = d*Hp*Wp + h*Wp + w (padded strides, d < Do).  Positions with h >= Ho
    # or w >= Wo are junk; they are masked out of GN stats and cropped below.
    NP = Do * HpWp
    NPcols = _round_up(max(NP, 128), 128)
    KKKC = K * K * K * Cin
    KKKCpad = _round_up(KKKC, 128)

    max_off = (K - 1) * (HpWp + Wp + 1)
    LP = _round_up(max(Dp * HpWp, max_off + NPcols), 128)

    # ---- input: native NCDHW (no transpose!), bf16, zero-pad D/H, circular W,
    #      then flatten spatial dims and lane-pad to LP.
    xp = jnp.pad(x_ncdhw.astype(compute_dtype),
                 ((0, 0), (0, 0), (pad, pad), (pad, pad), (0, 0)))
    xp = jnp.pad(xp, ((0, 0), (0, 0), (0, 0), (0, 0), (pad, pad)), mode='wrap')
    xflat = jnp.pad(xp.reshape(N, Cin, Dp * HpWp),
                    ((0, 0), (0, 0), (0, LP - Dp * HpWp)))

    # ---- im2col weight: (Cout,Cin,K,K,K) -> (Cout,K,K,K,Cin) -> (Cout, KKKC),
    #      zero-padded on the contraction dim to KKKCpad.
    w2 = jnp.transpose(conv_w, (0, 2, 3, 4, 1)).reshape(Cout, KKKC)
    w2 = jnp.pad(w2, ((0, 0), (0, KKKCpad - KKKC))).astype(compute_dtype)
    b2 = conv_b.reshape(Cout, 1).astype(jnp.float32)

    # ---- GroupNorm params: num_groups = Cout // 4, exactly as the PyTorch module.
    if gn:
        assert Cout % 4 == 0, "module assumes ch_out divisible by 4 (GroupNorm)"
        gnw2 = gn_w.reshape(Cout, 1).astype(jnp.float32)
        gnb2 = gn_b.reshape(Cout, 1).astype(jnp.float32)
    else:
        gnw2 = jnp.ones((Cout, 1), jnp.float32)
        gnb2 = jnp.zeros((Cout, 1), jnp.float32)
    groups = max(Cout // 4, 1)
    cpg = Cout // groups
    ch = np.arange(Cout)
    gmat = jnp.asarray(np.where((ch[:, None] // cpg) == (ch[None, :] // cpg),
                                1.0 / cpg, 0.0), jnp.float32)

    # ---- valid-column mask, pre-scaled by 1/count (host constant).
    pidx = np.arange(NPcols)
    rem = pidx % HpWp
    valid = (pidx < NP) & ((rem // Wp) < Ho) & ((rem % Wp) < Wo)
    maskw = jnp.asarray((valid.astype(np.float32) / float(count)).reshape(1, NPcols))

    # Tap lane offsets (match the (kd,kh,kw,Cin) ordering of the weight columns).
    taps = tuple(kd * HpWp + kh * Wp + kw
                 for kd in range(K) for kh in range(K) for kw in range(K))

    kernel = functools.partial(_conv_gn_kernel, taps=taps, cin=Cin, kkkc=KKKC,
                               use_gn=gn, eps=eps)

    itm = jnp.dtype(compute_dtype).itemsize
    cost = pl.CostEstimate(
        flops=2 * N * Cout * KKKCpad * NPcols,
        transcendentals=N * Cout,
        bytes_accessed=(N * Cin * LP * itm + Cout * KKKCpad * itm
                        + N * Cout * NPcols * 4))

    # VMEM budget: patch slab + double-buffered input/output blocks (+ small operands).
    vmem_need = (KKKCpad * NPcols * itm
                 + 2 * _round_up(Cin, 16) * LP * itm
                 + 2 * _round_up(Cout, 8) * NPcols * 4
                 + 8 * 128 * 128)
    # 128 MiB physical VMEM on v5e/v6e but only 64 MiB on v7x -> cap at ~48 MiB.
    vmem_limit = int(min(48 * 2 ** 20, max(32 * 2 ** 20, 2 * vmem_need)))

    out = pl.pallas_call(
        kernel,
        out_shape=jax.ShapeDtypeStruct((N, Cout, NPcols), jnp.float32),
        grid_spec=pltpu.PrefetchScalarGridSpec(
            num_scalar_prefetch=0,
            grid=(N,),
            in_specs=[
                pl.BlockSpec((1, Cin, LP), lambda n: (n, 0, 0)),
                pl.BlockSpec((Cout, KKKCpad), lambda n: (0, 0)),
                pl.BlockSpec((Cout, 1), lambda n: (0, 0)),
                pl.BlockSpec((Cout, 1), lambda n: (0, 0)),
                pl.BlockSpec((Cout, 1), lambda n: (0, 0)),
                pl.BlockSpec((Cout, Cout), lambda n: (0, 0)),
                pl.BlockSpec((1, NPcols), lambda n: (0, 0)),
            ],
            out_specs=pl.BlockSpec((1, Cout, NPcols), lambda n: (n, 0, 0)),
            scratch_shapes=[pltpu.VMEM((KKKCpad, NPcols), compute_dtype)]),
        compiler_params=pltpu.CompilerParams(
            dimension_semantics=("parallel",),
            vmem_limit_bytes=vmem_limit),
        cost_estimate=cost,
    )(xflat, w2, b2, gnw2, gnb2, gmat, maskw)

    # Crop the padded-stride columns back to (N, Cout, Do, Ho, Wo).  The f32
    # residual add and the ReLU fuse into this single XLA slice pass, so the
    # residual stays in its native NCDHW layout and full f32 precision and no
    # extra HBM pass is introduced.
    y = out[:, :, :NP].reshape(N, Cout, Do, Hp, Wp)[:, :, :, :Ho, :Wo]
    if residual is not None:
        y = y + residual
    if relu:
        y = jnp.maximum(y, 0.0)
    return y


def _reference(x, conv_w, conv_b, gn_w, gn_b, residual, pad, gn=True, relu=True,
               eps=1e-5):
    """Pure-JAX f32 reference mirroring the PyTorch forward."""
    xp = jnp.pad(x, ((0, 0), (0, 0), (0, 0), (0, 0), (pad, pad)), mode='wrap')
    y = lax.conv_general_dilated(
        xp, conv_w, window_strides=(1, 1, 1),
        padding=((pad, pad), (pad, pad), (0, 0)),
        dimension_numbers=('NCDHW', 'OIDHW', 'NCDHW'))
    y = y + conv_b[None, :, None, None, None]
    if gn:
        Nn, C, Dd, Hh, Ww = y.shape
        G = C // 4
        yg = y.reshape(Nn, G, C // G, Dd, Hh, Ww)
        mean = yg.mean(axis=(2, 3, 4, 5), keepdims=True)
        var = ((yg - mean) ** 2).mean(axis=(2, 3, 4, 5), keepdims=True)
        y = ((yg - mean) / jnp.sqrt(var + eps)).reshape(Nn, C, Dd, Hh, Ww)
        y = y * gn_w[None, :, None, None, None] + gn_b[None, :, None, None, None]
    if residual is not None:
        y = y + residual
    if relu:
        y = jnp.maximum(y, 0.0)
    return y


if __name__ == "__main__":
    key = jax.random.PRNGKey(0)
    k1, k2, k3, k4, k5, k6 = jax.random.split(key, 6)

    # Small shapes consistent with the module: Conv3d input is (N, Cin, D, H, W).
    N, Cin, Cout = 2, 4, 8
    D, H, W = 4, 8, 8
    K, pad = 3, 1

    x = jax.random.normal(k1, (N, Cin, D, H, W), jnp.float32)
    conv_w = jax.random.normal(k2, (Cout, Cin, K, K, K), jnp.float32) * 0.1
    conv_b = jax.random.normal(k3, (Cout,), jnp.float32) * 0.1
    gn_w = 1.0 + 0.1 * jax.random.normal(k4, (Cout,), jnp.float32)
    gn_b = 0.1 * jax.random.normal(k5, (Cout,), jnp.float32)
    residual = jax.random.normal(k6, (N, Cout, D, H, W), jnp.float32) * 0.1

    # The kernel computes the conv in bf16 with f32 accumulation; compare against
    # a pure-JAX f32 reference on the same bf16-rounded conv inputs.  The residual
    # is NOT rounded: the kernel path keeps it in full f32.
    rb = lambda a: a.astype(jnp.bfloat16).astype(jnp.float32)

    out = horizontal_circular_conv3d(x, conv_w, conv_b, gn_w, gn_b, residual,
                                     pad=pad, gn=True, relu=True)
    out = jax.block_until_ready(out)
    ref = _reference(rb(x), rb(conv_w), conv_b, gn_w, gn_b, residual, pad)
    np.testing.assert_allclose(np.asarray(out), np.asarray(ref),
                               rtol=2e-3, atol=2e-3)

    # Residual-free variant.
    out2 = horizontal_circular_conv3d(x, conv_w, conv_b, gn_w, gn_b, None,
                                      pad=pad, gn=True, relu=True)
    out2 = jax.block_until_ready(out2)
    ref2 = _reference(rb(x), rb(conv_w), conv_b, gn_w, gn_b, None, pad)
    np.testing.assert_allclose(np.asarray(out2), np.asarray(ref2),
                               rtol=2e-3, atol=2e-3)

    print("KERNEL_OK")
</pallas_src>

<mosaic_0001>
module attributes {stable_mosaic.version = 11 : i64} {
  func.func @_conv_gn_kernel(%arg0: i32, %arg1: memref<1x4x768xbf16, #tpu.memory_space<vmem>>, %arg2: memref<8x128xbf16, #tpu.memory_space<vmem>>, %arg3: memref<8x1xf32, #tpu.memory_space<vmem>>, %arg4: memref<8x1xf32, #tpu.memory_space<vmem>>, %arg5: memref<8x1xf32, #tpu.memory_space<vmem>>, %arg6: memref<8x8xf32, #tpu.memory_space<vmem>>, %arg7: memref<1x512xf32, #tpu.memory_space<vmem>>, %arg8: memref<1x8x512xf32, #tpu.memory_space<vmem>>, %arg9: memref<128x512xbf16, #tpu.memory_space<vmem>>) attributes {dimension_semantics = [#tpu.dimension_semantics<parallel>], iteration_bounds = array<i64: 2>, scalar_prefetch = 0 : i64, scratch_operands = 1 : i64, tpu.core_type = #tpu.core_type<tc>, window_params = [{transform_indices = @transform_0, window_bounds = array<i64: 1, 4, 768>}, {pipeline_mode = #tpu.pipeline_mode<synchronous>, transform_indices = @transform_1, window_bounds = array<i64: 8, 128>}, {pipeline_mode = #tpu.pipeline_mode<synchronous>, transform_indices = @transform_2, window_bounds = array<i64: 8, 1>}, {pipeline_mode = #tpu.pipeline_mode<synchronous>, transform_indices = @transform_3, window_bounds = array<i64: 8, 1>}, {pipeline_mode = #tpu.pipeline_mode<synchronous>, transform_indices = @transform_4, window_bounds = array<i64: 8, 1>}, {pipeline_mode = #tpu.pipeline_mode<synchronous>, transform_indices = @transform_5, window_bounds = array<i64: 8, 8>}, {pipeline_mode = #tpu.pipeline_mode<synchronous>, transform_indices = @transform_6, window_bounds = array<i64: 1, 512>}, {transform_indices = @transform_7, window_bounds = array<i64: 1, 8, 512>}]} {
    %cst = arith.constant 0.000000e+00 : bf16
    %0 = vector.broadcast %cst : bf16 to vector<20x512xbf16>
    %c108 = arith.constant 108 : index
    %c0 = arith.constant 0 : index
    %1 = vector.load %arg9[%c108, %c0] : memref<128x512xbf16, #tpu.memory_space<vmem>>, vector<20x512xbf16>
    tpu.vector_store %arg9[%c108, %c0], %0 {strides = array<i32>} : memref<128x512xbf16, #tpu.memory_space<vmem>>, vector<20x512xbf16>,
    %c0_0 = arith.constant 0 : index
    %c0_1 = arith.constant 0 : index
    %c0_2 = arith.constant 0 : index
    %2 = vector.load %arg1[%c0_0, %c0_1, %c0_2] : memref<1x4x768xbf16, #tpu.memory_space<vmem>>, vector<1x4x512xbf16>
    %3 = vector.shape_cast %2 : vector<1x4x512xbf16> to vector<4x512xbf16>
    %c0_3 = arith.constant 0 : index
    %c0_4 = arith.constant 0 : index
    %4 = vector.load %arg9[%c0_3, %c0_4] : memref<128x512xbf16, #tpu.memory_space<vmem>>, vector<4x512xbf16>
    tpu.vector_store %arg9[%c0_3, %c0_4], %3 {strides = array<i32>} : memref<128x512xbf16, #tpu.memory_space<vmem>>, vector<4x512xbf16>,
    %c0_5 = arith.constant 0 : index
    %c0_6 = arith.constant 0 : index
    %c1 = arith.constant 1 : index
    %5 = vector.load %arg1[%c0_5, %c0_6, %c1] : memref<1x4x768xbf16, #tpu.memory_space<vmem>>, vector<1x4x512xbf16>
    %6 = vector.shape_cast %5 : vector<1x4x512xbf16> to vector<4x512xbf16>
    %c4 = arith.constant 4 : index
    %c0_7 = arith.constant 0 : index
    %7 = vector.load %arg9[%c4, %c0_7] : memref<128x512xbf16, #tpu.memory_space<vmem>>, vector<4x512xbf16>
    tpu.vector_store %arg9[%c4, %c0_7], %6 {strides = array<i32>} : memref<128x512xbf16, #tpu.memory_space<vmem>>, vector<4x512xbf16>,
    %c0_8 = arith.constant 0 : index
    %c0_9 = arith.constant 0 : index
    %c2 = arith.constant 2 : index
    %8 = vector.load %arg1[%c0_8, %c0_9, %c2] : memref<1x4x768xbf16, #tpu.memory_space<vmem>>, vector<1x4x512xbf16>
    %9 = vector.shape_cast %8 : vector<1x4x512xbf16> to vector<4x512xbf16>
    %c8 = arith.constant 8 : index
    %c0_10 = arith.constant 0 : index
    %10 = vector.load %arg9[%c8, %c0_10] : memref<128x512xbf16, #tpu.memory_space<vmem>>, vector<4x512xbf16>
    tpu.vector_store %arg9[%c8, %c0_10], %9 {strides = array<i32>} : memref<128x512xbf16, #tpu.memory_space<vmem>>, vector<4x512xbf16>,
    %c0_11 = arith.constant 0 : index
    %c0_12 = arith.constant 0 : index
    %c10 = arith.constant 10 : index
    %11 = vector.load %arg1[%c0_11, %c0_12, %c10] : memref<1x4x768xbf16, #tpu.memory_space<vmem>>, vector<1x4x512xbf16>
    %12 = vector.shape_cast %11 : vector<1x4x512xbf16> to vector<4x512xbf16>
    %c12 = arith.constant 12 : index
    %c0_13 = arith.constant 0 : index
    %13 = vector.load %arg9[%c12, %c0_13] : memref<128x512xbf16, #tpu.memory_space<vmem>>, vector<4x512xbf16>
    tpu.vector_store %arg9[%c12, %c0_13], %12 {strides = array<i32>} : memref<128x512xbf16, #tpu.memory_space<vmem>>, vector<4x512xbf16>,
    %c0_14 = arith.constant 0 : index
    %c0_15 = arith.constant 0 : index
    %c11 = arith.constant 11 : index
    %14 = vector.load %arg1[%c0_14, %c0_15, %c11] : memref<1x4x768xbf16, #tpu.memory_space<vmem>>, vector<1x4x512xbf16>
    %15 = vector.shape_cast %14 : vector<1x4x512xbf16> to vector<4x512xbf16>
    %c16 = arith.constant 16 : index
    %c0_16 = arith.constant 0 : index
    %16 = vector.load %arg9[%c16, %c0_16] : memref<128x512xbf16, #tpu.memory_space<vmem>>, vector<4x512xbf16>
    tpu.vector_store %arg9[%c16, %c0_16], %15 {strides = array<i32>} : memref<128x512xbf16, #tpu.memory_space<vmem>>, vector<4x512xbf16>,
    %c0_17 = arith.constant 0 : index
    %c0_18 = arith.constant 0 : index
    %c12_19 = arith.constant 12 : index
    %17 = vector.load %arg1[%c0_17, %c0_18, %c12_19] : memref<1x4x768xbf16, #tpu.memory_space<vmem>>, vector<1x4x512xbf16>
    %18 = vector.shape_cast %17 : vector<1x4x512xbf16> to vector<4x512xbf16>
    %c20 = arith.constant 20 : index
    %c0_20 = arith.constant 0 : index
    %19 = vector.load %arg9[%c20, %c0_20] : memref<128x512xbf16, #tpu.memory_space<vmem>>, vector<4x512xbf16>
    tpu.vector_store %arg9[%c20, %c0_20], %18 {strides = array<i32>} : memref<128x512xbf16, #tpu.memory_space<vmem>>, vector<4x512xbf16>,
    %c0_21 = arith.constant 0 : index
    %c0_22 = arith.constant 0 : index
    %c20_23 = arith.constant 20 : index
    %20 = vector.load %arg1[%c0_21, %c0_22, %c20_23] : memref<1x4x768xbf16, #tpu.memory_space<vmem>>, vector<1x4x512xbf16>
    %21 = vector.shape_cast %20 : vector<1x4x512xbf16> to vector<4x512xbf16>
    %c24 = arith.constant 24 : index
    %c0_24 = arith.constant 0 : index
    %22 = vector.load %arg9[%c24, %c0_24] : memref<128x512xbf16, #tpu.memory_space<vmem>>, vector<4x512xbf16>
    tpu.vector_store %arg9[%c24, %c0_24], %21 {strides = array<i32>} : memref<128x512xbf16, #tpu.memory_space<vmem>>, vector<4x512xbf16>,
    %c0_25 = arith.constant 0 : index
    %c0_26 = arith.constant 0 : index
    %c21 = arith.constant 21 : index
    %23 = vector.load %arg1[%c0_25, %c0_26, %c21] : memref<1x4x768xbf16, #tpu.memory_space<vmem>>, vector<1x4x512xbf16>
    %24 = vector.shape_cast %23 : vector<1x4x512xbf16> to vector<4x512xbf16>
    %c28 = arith.constant 28 : index
    %c0_27 = arith.constant 0 : index
    %25 = vector.load %arg9[%c28, %c0_27] : memref<128x512xbf16, #tpu.memory_space<vmem>>, vector<4x512xbf16>
    tpu.vector_store %arg9[%c28, %c0_27], %24 {strides = array<i32>} : memref<128x512xbf16, #tpu.memory_space<vmem>>, vector<4x512xbf16>,
    %c0_28 = arith.constant 0 : index
    %c0_29 = arith.constant 0 : index
    %c22 = arith.constant 22 : index
    %26 = vector.load %arg1[%c0_28, %c0_29, %c22] : memref<1x4x768xbf16, #tpu.memory_space<vmem>>, vector<1x4x512xbf16>
    %27 = vector.shape_cast %26 : vector<1x4x512xbf16> to vector<4x512xbf16>
    %c32 = arith.constant 32 : index
    %c0_30 = arith.constant 0 : index
    %28 = vector.load %arg9[%c32, %c0_30] : memref<128x512xbf16, #tpu.memory_space<vmem>>, vector<4x512xbf16>
    tpu.vector_store %arg9[%c32, %c0_30], %27 {strides = array<i32>} : memref<128x512xbf16, #tpu.memory_space<vmem>>, vector<4x512xbf16>,
    %c0_31 = arith.constant 0 : index
    %c0_32 = arith.constant 0 : index
    %c100 = arith.constant 100 : index
    %29 = vector.load %arg1[%c0_31, %c0_32, %c100] : memref<1x4x768xbf16, #tpu.memory_space<vmem>>, vector<1x4x512xbf16>
    %30 = vector.shape_cast %29 : vector<1x4x512xbf16> to vector<4x512xbf16>
    %c36 = arith.constant 36 : index
    %c0_33 = arith.constant 0 : index
    %31 = vector.load %arg9[%c36, %c0_33] : memref<128x512xbf16, #tpu.memory_space<vmem>>, vector<4x512xbf16>
    tpu.vector_store %arg9[%c36, %c0_33], %30 {strides = array<i32>} : memref<128x512xbf16, #tpu.memory_space<vmem>>, vector<4x512xbf16>,
    %c0_34 = arith.constant 0 : index
    %c0_35 = arith.constant 0 : index
    %c101 = arith.constant 101 : index
    %32 = vector.load %arg1[%c0_34, %c0_35, %c101] : memref<1x4x768xbf16, #tpu.memory_space<vmem>>, vector<1x4x512xbf16>
    %33 = vector.shape_cast %32 : vector<1x4x512xbf16> to vector<4x512xbf16>
    %c40 = arith.constant 40 : index
    %c0_36 = arith.constant 0 : index
    %34 = vector.load %arg9[%c40, %c0_36] : memref<128x512xbf16, #tpu.memory_space<vmem>>, vector<4x512xbf16>
    tpu.vector_store %arg9[%c40, %c0_36], %33 {strides = array<i32>} : memref<128x512xbf16, #tpu.memory_space<vmem>>, vector<4x512xbf16>,
    %c0_37 = arith.constant 0 : index
    %c0_38 = arith.constant 0 : index
    %c102 = arith.constant 102 : index
    %35 = vector.load %arg1[%c0_37, %c0_38, %c102] : memref<1x4x768xbf16, #tpu.memory_space<vmem>>, vector<1x4x512xbf16>
    %36 = vector.shape_cast %35 : vector<1x4x512xbf16> to vector<4x512xbf16>
    %c44 = arith.constant 44 : index
    %c0_39 = arith.constant 0 : index
    %37 = vector.load %arg9[%c44, %c0_39] : memref<128x512xbf16, #tpu.memory_space<vmem>>, vector<4x512xbf16>
    tpu.vector_store %arg9[%c44, %c0_39], %36 {strides = array<i32>} : memref<128x512xbf16, #tpu.memory_space<vmem>>, vector<4x512xbf16>,
    %c0_40 = arith.constant 0 : index
    %c0_41 = arith.constant 0 : index
    %c110 = arith.constant 110 : index
    %38 = vector.load %arg1[%c0_40, %c0_41, %c110] : memref<1x4x768xbf16, #tpu.memory_space<vmem>>, vector<1x4x512xbf16>
    %39 = vector.shape_cast %38 : vector<1x4x512xbf16> to vector<4x512xbf16>
    %c48 = arith.constant 48 : index
    %c0_42 = arith.constant 0 : index
    %40 = vector.load %arg9[%c48, %c0_42] : memref<128x512xbf16, #tpu.memory_space<vmem>>, vector<4x512xbf16>
    tpu.vector_store %arg9[%c48, %c0_42], %39 {strides = array<i32>} : memref<128x512xbf16, #tpu.memory_space<vmem>>, vector<4x512xbf16>,
    %c0_43 = arith.constant 0 : index
    %c0_44 = arith.constant 0 : index
    %c111 = arith.constant 111 : index
    %41 = vector.load %arg1[%c0_43, %c0_44, %c111] : memref<1x4x768xbf16, #tpu.memory_space<vmem>>, vector<1x4x512xbf16>
    %42 = vector.shape_cast %41 : vector<1x4x512xbf16> to vector<4x512xbf16>
    %c52 = arith.constant 52 : index
    %c0_45 = arith.constant 0 : index
    %43 = vector.load %arg9[%c52, %c0_45] : memref<128x512xbf16, #tpu.memory_space<vmem>>, vector<4x512xbf16>
    tpu.vector_store %arg9[%c52, %c0_45], %42 {strides = array<i32>} : memref<128x512xbf16, #tpu.memory_space<vmem>>, vector<4x512xbf16>,
    %c0_46 = arith.constant 0 : index
    %c0_47 = arith.constant 0 : index
    %c112 = arith.constant 112 : index
    %44 = vector.load %arg1[%c0_46, %c0_47, %c112] : memref<1x4x768xbf16, #tpu.memory_space<vmem>>, vector<1x4x512xbf16>
    %45 = vector.shape_cast %44 : vector<1x4x512xbf16> to vector<4x512xbf16>
    %c56 = arith.constant 56 : index
    %c0_48 = arith.constant 0 : index
    %46 = vector.load %arg9[%c56, %c0_48] : memref<128x512xbf16, #tpu.memory_space<vmem>>, vector<4x512xbf16>
    tpu.vector_store %arg9[%c56, %c0_48], %45 {strides = array<i32>} : memref<128x512xbf16, #tpu.memory_space<vmem>>, vector<4x512xbf16>,
    %c0_49 = arith.constant 0 : index
    %c0_50 = arith.constant 0 : index
    %c120 = arith.constant 120 : index
    %47 = vector.load %arg1[%c0_49, %c0_50, %c120] : memref<1x4x768xbf16, #tpu.memory_space<vmem>>, vector<1x4x512xbf16>
    %48 = vector.shape_cast %47 : vector<1x4x512xbf16> to vector<4x512xbf16>
    %c60 = arith.constant 60 : index
    %c0_51 = arith.constant 0 : index
    %49 = vector.load %arg9[%c60, %c0_51] : memref<128x512xbf16, #tpu.memory_space<vmem>>, vector<4x512xbf16>
    tpu.vector_store %arg9[%c60, %c0_51], %48 {strides = array<i32>} : memref<128x512xbf16, #tpu.memory_space<vmem>>, vector<4x512xbf16>,
    %c0_52 = arith.constant 0 : index
    %c0_53 = arith.constant 0 : index
    %c121 = arith.constant 121 : index
    %50 = vector.load %arg1[%c0_52, %c0_53, %c121] : memref<1x4x768xbf16, #tpu.memory_space<vmem>>, vector<1x4x512xbf16>
    %51 = vector.shape_cast %50 : vector<1x4x512xbf16> to vector<4x512xbf16>
    %c64 = arith.constant 64 : index
    %c0_54 = arith.constant 0 : index
    %52 = vector.load %arg9[%c64, %c0_54] : memref<128x512xbf16, #tpu.memory_space<vmem>>, vector<4x512xbf16>
    tpu.vector_store %arg9[%c64, %c0_54], %51 {strides = array<i32>} : memref<128x512xbf16, #tpu.memory_space<vmem>>, vector<4x512xbf16>,
    %c0_55 = arith.constant 0 : index
    %c0_56 = arith.constant 0 : index
    %c122 = arith.constant 122 : index
    %53 = vector.load %arg1[%c0_55, %c0_56, %c122] : memref<1x4x768xbf16, #tpu.memory_space<vmem>>, vector<1x4x512xbf16>
    %54 = vector.shape_cast %53 : vector<1x4x512xbf16> to vector<4x512xbf16>
    %c68 = arith.constant 68 : index
    %c0_57 = arith.constant 0 : index
    %55 = vector.load %arg9[%c68, %c0_57] : memref<128x512xbf16, #tpu.memory_space<vmem>>, vector<4x512xbf16>
    tpu.vector_store %arg9[%c68, %c0_57], %54 {strides = array<i32>} : memref<128x512xbf16, #tpu.memory_space<vmem>>, vector<4x512xbf16>,
    %c0_58 = arith.constant 0 : index
    %c0_59 = arith.constant 0 : index
    %c200 = arith.constant 200 : index
    %56 = vector.load %arg1[%c0_58, %c0_59, %c200] : memref<1x4x768xbf16, #tpu.memory_space<vmem>>, vector<1x4x512xbf16>
    %57 = vector.shape_cast %56 : vector<1x4x512xbf16> to vector<4x512xbf16>
    %c72 = arith.constant 72 : index
    %c0_60 = arith.constant 0 : index
    %58 = vector.load %arg9[%c72, %c0_60] : memref<128x512xbf16, #tpu.memory_space<vmem>>, vector<4x512xbf16>
    tpu.vector_store %arg9[%c72, %c0_60], %57 {strides = array<i32>} : memref<128x512xbf16, #tpu.memory_space<vmem>>, vector<4x512xbf16>,
    %c0_61 = arith.constant 0 : index
    %c0_62 = arith.constant 0 : index
    %c201 = arith.constant 201 : index
    %59 = vector.load %arg1[%c0_61, %c0_62, %c201] : memref<1x4x768xbf16, #tpu.memory_space<vmem>>, vector<1x4x512xbf16>
    %60 = vector.shape_cast %59 : vector<1x4x512xbf16> to vector<4x512xbf16>
    %c76 = arith.constant 76 : index
    %c0_63 = arith.constant 0 : index
    %61 = vector.load %arg9[%c76, %c0_63] : memref<128x512xbf16, #tpu.memory_space<vmem>>, vector<4x512xbf16>
    tpu.vector_store %arg9[%c76, %c0_63], %60 {strides = array<i32>} : memref<128x512xbf16, #tpu.memory_space<vmem>>, vector<4x512xbf16>,
    %c0_64 = arith.constant 0 : index
    %c0_65 = arith.constant 0 : index
    %c202 = arith.constant 202 : index
    %62 = vector.load %arg1[%c0_64, %c0_65, %c202] : memref<1x4x768xbf16, #tpu.memory_space<vmem>>, vector<1x4x512xbf16>
    %63 = vector.shape_cast %62 : vector<1x4x512xbf16> to vector<4x512xbf16>
    %c80 = arith.constant 80 : index
    %c0_66 = arith.constant 0 : index
    %64 = vector.load %arg9[%c80, %c0_66] : memref<128x512xbf16, #tpu.memory_space<vmem>>, vector<4x512xbf16>
    tpu.vector_store %arg9[%c80, %c0_66], %63 {strides = array<i32>} : memref<128x512xbf16, #tpu.memory_space<vmem>>, vector<4x512xbf16>,
    %c0_67 = arith.constant 0 : index
    %c0_68 = arith.constant 0 : index
    %c210 = arith.constant 210 : index
    %65 = vector.load %arg1[%c0_67, %c0_68, %c210] : memref<1x4x768xbf16, #tpu.memory_space<vmem>>, vector<1x4x512xbf16>
    %66 = vector.shape_cast %65 : vector<1x4x512xbf16> to vector<4x512xbf16>
    %c84 = arith.constant 84 : index
    %c0_69 = arith.constant 0 : index
    %67 = vector.load %arg9[%c84, %c0_69] : memref<128x512xbf16, #tpu.memory_space<vmem>>, vector<4x512xbf16>
    tpu.vector_store %arg9[%c84, %c0_69], %66 {strides = array<i32>} : memref<128x512xbf16, #tpu.memory_space<vmem>>, vector<4x512xbf16>,
    %c0_70 = arith.constant 0 : index
    %c0_71 = arith.constant 0 : index
    %c211 = arith.constant 211 : index
    %68 = vector.load %arg1[%c0_70, %c0_71, %c211] : memref<1x4x768xbf16, #tpu.memory_space<vmem>>, vector<1x4x512xbf16>
    %69 = vector.shape_cast %68 : vector<1x4x512xbf16> to vector<4x512xbf16>
    %c88 = arith.constant 88 : index
    %c0_72 = arith.constant 0 : index
    %70 = vector.load %arg9[%c88, %c0_72] : memref<128x512xbf16, #tpu.memory_space<vmem>>, vector<4x512xbf16>
    tpu.vector_store %arg9[%c88, %c0_72], %69 {strides = array<i32>} : memref<128x512xbf16, #tpu.memory_space<vmem>>, vector<4x512xbf16>,
    %c0_73 = arith.constant 0 : index
    %c0_74 = arith.constant 0 : index
    %c212 = arith.constant 212 : index
    %71 = vector.load %arg1[%c0_73, %c0_74, %c212] : memref<1x4x768xbf16, #tpu.memory_space<vmem>>, vector<1x4x512xbf16>
    %72 = vector.shape_cast %71 : vector<1x4x512xbf16> to vector<4x512xbf16>
    %c92 = arith.constant 92 : index
    %c0_75 = arith.constant 0 : index
    %73 = vector.load %arg9[%c92, %c0_75] : memref<128x512xbf16, #tpu.memory_space<vmem>>, vector<4x512xbf16>
    tpu.vector_store %arg9[%c92, %c0_75], %72 {strides = array<i32>} : memref<128x512xbf16, #tpu.memory_space<vmem>>, vector<4x512xbf16>,
    %c0_76 = arith.constant 0 : index
    %c0_77 = arith.constant 0 : index
    %c220 = arith.constant 220 : index
    %74 = vector.load %arg1[%c0_76, %c0_77, %c220] : memref<1x4x768xbf16, #tpu.memory_space<vmem>>, vector<1x4x512xbf16>
    %75 = vector.shape_cast %74 : vector<1x4x512xbf16> to vector<4x512xbf16>
    %c96 = arith.constant 96 : index
    %c0_78 = arith.constant 0 : index
    %76 = vector.load %arg9[%c96, %c0_78] : memref<128x512xbf16, #tpu.memory_space<vmem>>, vector<4x512xbf16>
    tpu.vector_store %arg9[%c96, %c0_78], %75 {strides = array<i32>} : memref<128x512xbf16, #tpu.memory_space<vmem>>, vector<4x512xbf16>,
    %c0_79 = arith.constant 0 : index
    %c0_80 = arith.constant 0 : index
    %c221 = arith.constant 221 : index
    %77 = vector.load %arg1[%c0_79, %c0_80, %c221] : memref<1x4x768xbf16, #tpu.memory_space<vmem>>, vector<1x4x512xbf16>
    %78 = vector.shape_cast %77 : vector<1x4x512xbf16> to vector<4x512xbf16>
    %c100_81 = arith.constant 100 : index
    %c0_82 = arith.constant 0 : index
    %79 = vector.load %arg9[%c100_81, %c0_82] : memref<128x512xbf16, #tpu.memory_space<vmem>>, vector<4x512xbf16>
    tpu.vector_store %arg9[%c100_81, %c0_82], %78 {strides = array<i32>} : memref<128x512xbf16, #tpu.memory_space<vmem>>, vector<4x512xbf16>,
    %c0_83 = arith.constant 0 : index
    %c0_84 = arith.constant 0 : index
    %c222 = arith.constant 222 : index
    %80 = vector.load %arg1[%c0_83, %c0_84, %c222] : memref<1x4x768xbf16, #tpu.memory_space<vmem>>, vector<1x4x512xbf16>
    %81 = vector.shape_cast %80 : vector<1x4x512xbf16> to vector<4x512xbf16>
    %c104 = arith.constant 104 : index
    %c0_85 = arith.constant 0 : index
    %82 = vector.load %arg9[%c104, %c0_85] : memref<128x512xbf16, #tpu.memory_space<vmem>>, vector<4x512xbf16>
    tpu.vector_store %arg9[%c104, %c0_85], %81 {strides = array<i32>} : memref<128x512xbf16, #tpu.memory_space<vmem>>, vector<4x512xbf16>,
    %c0_86 = arith.constant 0 : index
    %c0_87 = arith.constant 0 : index
    %83 = vector.load %arg2[%c0_86, %c0_87] : memref<8x128xbf16, #tpu.memory_space<vmem>>, vector<8x128xbf16>
    %c0_88 = arith.constant 0 : index
    %c0_89 = arith.constant 0 : index
    %84 = vector.load %arg9[%c0_88, %c0_89] : memref<128x512xbf16, #tpu.memory_space<vmem>>, vector<128x512xbf16>
    %cst_90 = arith.constant dense<0.000000e+00> : vector<8x512xf32>
    %85 = tpu.matmul %83, %84, %cst_90 {dimension_numbers = #tpu.dot_dimension_numbers<[1], [0], [0], [1], [0, 0, 1, 1], [], []>} : vector<8x128xbf16>, vector<128x512xbf16>, vector<8x512xf32> -> vector<8x512xf32>
    %c0_91 = arith.constant 0 : index
    %c0_92 = arith.constant 0 : index
    %86 = vector.load %arg3[%c0_91, %c0_92] : memref<8x1xf32, #tpu.memory_space<vmem>>, vector<8x1xf32>
    %87 = vector.broadcast %86 : vector<8x1xf32> to vector<8x512xf32>
    %88 = arith.addf %85, %87 : vector<8x512xf32>
    %c0_93 = arith.constant 0 : index
    %c0_94 = arith.constant 0 : index
    %89 = vector.load %arg7[%c0_93, %c0_94] : memref<1x512xf32, #tpu.memory_space<vmem>>, vector<1x512xf32>
    %90 = vector.broadcast %89 : vector<1x512xf32> to vector<8x512xf32>
    %91 = arith.mulf %88, %90 : vector<8x512xf32>
    %cst_95 = arith.constant dense<0.000000e+00> : vector<8xf32>
    %92 = vector.multi_reduction <add>, %91, %cst_95 [1] : vector<8x512xf32> to vector<8xf32>
    %93 = vector.shape_cast %92 : vector<8xf32> to vector<8x1xf32>
    %c0_96 = arith.constant 0 : index
    %c0_97 = arith.constant 0 : index
    %94 = vector.load %arg6[%c0_96, %c0_97] : memref<8x8xf32, #tpu.memory_space<vmem>>, vector<8x8xf32>
    %cst_98 = arith.constant dense<0.000000e+00> : vector<8x1xf32>
    %95 = tpu.matmul %94, %93, %cst_98 {dimension_numbers = #tpu.dot_dimension_numbers<[1], [0], [0], [1], [0, 0, 1, 1], [], []>} : vector<8x8xf32>, vector<8x1xf32>, vector<8x1xf32> -> vector<8x1xf32>
    %96 = vector.broadcast %95 : vector<8x1xf32> to vector<8x512xf32>
    %97 = arith.subf %88, %96 : vector<8x512xf32>
    %98 = arith.mulf %97, %97 : vector<8x512xf32>
    %99 = vector.broadcast %89 : vector<1x512xf32> to vector<8x512xf32>
    %100 = arith.mulf %98, %99 : vector<8x512xf32>
    %cst_99 = arith.constant dense<0.000000e+00> : vector<8xf32>
    %101 = vector.multi_reduction <add>, %100, %cst_99 [1] : vector<8x512xf32> to vector<8xf32>
    %102 = vector.shape_cast %101 : vector<8xf32> to vector<8x1xf32>
    %c0_100 = arith.constant 0 : index
    %c0_101 = arith.constant 0 : index
    %103 = vector.load %arg6[%c0_100, %c0_101] : memref<8x8xf32, #tpu.memory_space<vmem>>, vector<8x8xf32>
    %cst_102 = arith.constant dense<0.000000e+00> : vector<8x1xf32>
    %104 = tpu.matmul %103, %102, %cst_102 {dimension_numbers = #tpu.dot_dimension_numbers<[1], [0], [0], [1], [0, 0, 1, 1], [], []>} : vector<8x8xf32>, vector<8x1xf32>, vector<8x1xf32> -> vector<8x1xf32>
    %cst_103 = arith.constant 9.99999974E-6 : f32
    %105 = vector.broadcast %cst_103 : f32 to vector<8x1xf32>
    %106 = arith.addf %104, %105 : vector<8x1xf32>
    %107 = math.rsqrt %106 : vector<8x1xf32>
    %108 = vector.broadcast %107 : vector<8x1xf32> to vector<8x512xf32>
    %109 = arith.mulf %97, %108 : vector<8x512xf32>
    %c0_104 = arith.constant 0 : index
    %c0_105 = arith.constant 0 : index
    %110 = vector.load %arg4[%c0_104, %c0_105] : memref<8x1xf32, #tpu.memory_space<vmem>>, vector<8x1xf32>
    %111 = vector.broadcast %110 : vector<8x1xf32> to vector<8x512xf32>
    %112 = arith.mulf %109, %111 : vector<8x512xf32>
    %c0_106 = arith.constant 0 : index
    %c0_107 = arith.constant 0 : index
    %113 = vector.load %arg5[%c0_106, %c0_107] : memref<8x1xf32, #tpu.memory_space<vmem>>, vector<8x1xf32>
    %114 = vector.broadcast %113 : vector<8x1xf32> to vector<8x512xf32>
    %115 = arith.addf %112, %114 : vector<8x512xf32>
    %c0_108 = arith.constant 0 : index
    %c0_109 = arith.constant 0 : index
    %c0_110 = arith.constant 0 : index
    %116 = vector.load %arg8[%c0_108, %c0_109, %c0_110] : memref<1x8x512xf32, #tpu.memory_space<vmem>>, vector<1x8x512xf32>
    %117 = vector.shape_cast %116 : vector<1x8x512xf32> to vector<8x512xf32>
    %118 = vector.shape_cast %115 : vector<8x512xf32> to vector<1x8x512xf32>
    tpu.vector_store %arg8[%c0_108, %c0_109, %c0_110], %118 {strides = array<i32>} : memref<1x8x512xf32, #tpu.memory_space<vmem>>, vector<1x8x512xf32>,
    return
  }
  func.func @transform_0(%arg0: i32) -> (i32, i32, i32) {
    %c0_i32 = arith.constant 0 : i32
    %c0_i32_0 = arith.constant 0 : i32
    %c0_i32_1 = arith.constant 0 : i32
    return %arg0, %c0_i32, %c0_i32_0 : i32, i32, i32
  }
  func.func @transform_1(%arg0: i32) -> (i32, i32) {
    %c0_i32 = arith.constant 0 : i32
    %c0_i32_0 = arith.constant 0 : i32
    %c0_i32_1 = arith.constant 0 : i32
    return %c0_i32, %c0_i32_0 : i32, i32
  }
  func.func @transform_2(%arg0: i32) -> (i32, i32) {
    %c0_i32 = arith.constant 0 : i32
    %c0_i32_0 = arith.constant 0 : i32
    %c0_i32_1 = arith.constant 0 : i32
    return %c0_i32, %c0_i32_0 : i32, i32
  }
  func.func @transform_3(%arg0: i32) -> (i32, i32) {
    %c0_i32 = arith.constant 0 : i32
    %c0_i32_0 = arith.constant 0 : i32
    %c0_i32_1 = arith.constant 0 : i32
    return %c0_i32, %c0_i32_0 : i32, i32
  }
  func.func @transform_4(%arg0: i32) -> (i32, i32) {
    %c0_i32 = arith.constant 0 : i32
    %c0_i32_0 = arith.constant 0 : i32
    %c0_i32_1 = arith.constant 0 : i32
    return %c0_i32, %c0_i32_0 : i32, i32
  }
  func.func @transform_5(%arg0: i32) -> (i32, i32) {
    %c0_i32 = arith.constant 0 : i32
    %c0_i32_0 = arith.constant 0 : i32
    %c0_i32_1 = arith.constant 0 : i32
    return %c0_i32, %c0_i32_0 : i32, i32
  }
  func.func @transform_6(%arg0: i32) -> (i32, i32) {
    %c0_i32 = arith.constant 0 : i32
    %c0_i32_0 = arith.constant 0 : i32
    %c0_i32_1 = arith.constant 0 : i32
    return %c0_i32, %c0_i32_0 : i32, i32
  }
  func.func @transform_7(%arg0: i32) -> (i32, i32, i32) {
    %c0_i32 = arith.constant 0 : i32
    %c0_i32_0 = arith.constant 0 : i32
    %c0_i32_1 = arith.constant 0 : i32
    return %arg0, %c0_i32, %c0_i32_0 : i32, i32, i32
  }
}

</mosaic_0001>

<bundles_post_ra>
// kernel: tpu_custom_call.1
= control target key start
LH: loop header
LB: loop body
LE: loop exit
PB: predicated region body
PF: predicated region fallthrough
CT: control target
= control target key end

     0   :  { %12 = vsyncpa [#allocation4], 0  ;;  %s3069_s0 = inlined_call_operand.vmem [shape: bf16[2,4,768], index: 0, kind: input, shape index: {}]   ;;  %s3070_s1 = inlined_call_operand.hbm [shape: bf16[8,128], index: 1, kind: input, shape index: {}]   ;;  %s3071_s2 = inlined_call_operand.vmem [shape: f32[8,1], index: 2, kind: input, shape index: {}]   ;;  %s3072_s3 = inlined_call_operand.vmem [shape: f32[8,1], index: 3, kind: input, shape index: {}]   ;;  %s3073_s4 = inlined_call_operand.vmem [shape: f32[8,1], index: 4, kind: input, shape index: {}]   ;;  %s3074_s5 = inlined_call_operand.vmem [shape: f32[8,8], index: 5, kind: input, shape index: {}]   ;;  %s3075_s6 = inlined_call_operand.vmem [shape: f32[1,512], index: 6, kind: input, shape index: {}]   ;;  %s3076_s7 = inlined_call_operand.hbm [shape: f32[2,8,512], index: 7, kind: output, shape index: {}]  }
   0x1   :  { %13 = vsyncpa [#allocation5], 0 }
   0x2   :  { %15 = vsyncpa [#allocation5 + $0x1], 0  ;;  %s2460_s24 = smov 0   ;;  %s2462_s25 = smov 0  }
   0x3   :  { %s2464_s26 = smov 0   ;;  %s2466_s27 = smov 0  }
   0x4 LB: > { %s2481_s28 = sadd.s32 4294967295, %s2386_s27   ;;  %s2075_s29 = sadd.s32 4294967294, %s2386_s27   ;;  %s2386_s27 = sphi %s2466_s27, %s3084_s27   ;;  %s2382_s26 = sphi %s2464_s26, %s3083_s26   ;;  %s2378_s25 = sphi %s2462_s25, %s3082_s25   ;;  %s2374_s24 = sphi %s2460_s24, %s3081_s24  }
   0x5   : > { %s2485_s30 = sadd.s32 1, %s2386_s27   ;;  %s180_s8 = sadd.s32 1, %s2382_s26 }
   0x6   : > { %s177_s9 = ssub.s32 %s2386_s27, %s2485_s30  ;;  %p190_p0 = scmp.ne.s32.totalorder %s2382_s26, %s2378_s25 }
   0x7   : > { %p178_p1 = scmp.eq.s32.totalorder %s177_s9, 0  ;;  %p191_p2 = scmp.eq.s32.totalorder %s2481_s28, 1 }
   0x8   : > { %p196_p3 = scmp.ne.s32.totalorder %s2378_s25, %s2374_s24  ;;  %p197_p4 = scmp.eq.s32.totalorder %s2075_s29, 1 }
   0x9   : > { %s2496_s10 = scalar_select %p178_p1, %s2382_s26, %s180_s8  }
   0xa   : > { %p2498_p5 = por %p191_p2, %p190_p0  ;;  %p2502_p6 = por %p197_p4, %p196_p3 }
   0xb   : > { %p2076_p7 = scmp.ge.s32.totalorder %s2386_s27, 1  ;;  %p204_p8 = scmp.lt.s32.totalorder %s2386_s27, 3 }
   0xc   : > { %s3078_s12 = scalar_select %p2502_p6, 1, 0 }
   0xd   : > { %p2167_p9 = scmp.eq.s32.totalorder %s2481_s28, 0  ;;  %p2509_p10 = pnand %p2076_p7, %p204_p8 }
   0xe   : > { %s2388_s14 = smov [#allocation3]  }
   0xf   : > { %s217_s15 = sshll.u32 %s2388_s14, 4  ;;  %p2159_p11 = pneg %p2509_p10  ;;  %s218_s15 = int_to_ptr.vmem [resolvable:$true] %s217_s15 }
  0x10   : > { %s2307_s16 = scalar_lea.vmem %s218_s15, 64  ;;  %p2315_p3 = scmp.lt.s32.totalorder %s218_s15, %s218_s15 }
  0x11   : > { %p2160_p12 = pnand %p2167_p9, %p2159_p11  ;;  %p2308_p0 = scmp.ne.s32.totalorder %s218_s15, %s2307_s16 }
  0x12   : > { %p2316_p4 = scmp.lt.s32.totalorder %s2307_s16, %s2307_s16 }
  0x13   : > { %p2298_p13 = pneg %p2160_p12 }
  0x14   : > { %p2317_p6 = por %p2316_p4, %p2315_p3 }
  0x15   : > { %p2310_p1 = pnand %p2308_p0, %p2298_p13 }
  0x17   : > { %p2311_p2 = pneg %p2310_p1 }
  0x19   : > { %p2318_p7 = pnand %p2317_p6, %p2311_p2 }
  0x1b   : > { %2321 = shalt.err (!%p2318_p7)
}
  0x1c   : > { %2162 = dma.hbm_to_vmem [thread:$0]  (!%p2160_p12), %s3070_s1, 64, %s218_s15, [#allocation4]  }
  0x1d   : > { %253 = sbr.rel (%p2509_p10) target bundleno = 1489 (0x5d1), region = 48 }
  0x22   : > { %2365 = dma.done.wait (%p2167_p9), [#allocation4], 64  }
  0x23   : > { %2367 = vsyncadd (%p2167_p9), [#allocation4], 4294967232  ;;  %p285_p8 = scmp.lt.s32.totalorder %s2481_s28, 1  ;;  %v326_v0 = vlaneseq  ;;  %v2389_v1 = vmov 1983009808   ;;  %s2390_s29 = smov 35  }
  0x24   : > { %v324_v2 = vunpack.c.l.s4 %v2389_v1  ;;  %s2391_s8 = smov 36   ;;  %s2392_s9 = smov 34   ;;  %v2394_v12 = vmov 0   ;;  %vm354_vm0 = vcmask 1043456   ;;  %vm1424_vm1 = vcmask 285696  }
  0x25   : > { %s286_s19 = scalar_select %p285_p8, %s2481_s28, 1  ;;  %v2528_v3 = vshrl.u32 %v326_v0, 7  ;;  %v2127_v13 = vcombine.high %v2394_v12, %v2394_v12  ;;  %291 = vst [vmem:[#allocation2 + $0xd0] sm:$0xcc] %v2394_v12  ;;  %292 = vst [vmem:[#allocation2 + $0xd8] sm:$0xcc] %v2394_v12  ;;  %v2126_v14 = vcombine.low %v2394_v12, %v2394_v12  ;;  %1707 = vmatprep.mubr.bf16.mxu0 %v2394_v12  ;;  %1748 = vmatprep.mubr.bf16.mxu1 %v2394_v12 }
  0x26   : > { %v325_v4 = vunpack.c.0.s8 %v324_v2  ;;  %s2393_s13 = smov 54   ;;  %2233 = vset.pattern.permute.xlu0 %v2394_v12  ;;  %2234 = vset.pattern.permute.xlu1 %v2394_v12  ;;  %s2395_s14 = smov 46   ;;  %vm1468_vm2 = vcmask 277504   ;;  %vm1379_vm3 = vcmask 293888   ;;  %vm1201_vm4 = vcmask 441344  }
  0x27   : > { %s2152_s20 = smul.u32 12, %s286_s19  ;;  %1675 = vmatprep.subr.bf16.mxu0 %v2127_v13  ;;  %1716 = vmatprep.subr.bf16.mxu1 %v2127_v13  ;;  %s2396_s15 = smov 45   ;;  %vm1246_vm5 = vcmask 375808   ;;  %vm1290_vm6 = vcmask 367616   ;;  %vm1335_vm7 = vcmask 359424   ;;  %vm1023_vm8 = vcmask 56320  }
  0x28   : > { %v2531_v5 = vsub.s32 %v325_v4, %v2528_v3  ;;  %1676 = vmatpush1.bf16.msra.mxu0 %v2126_v14  ;;  %1717 = vmatpush1.bf16.msra.mxu1 %v2126_v14  ;;  %s2397_s16 = smov 44   ;;  %s2398_s17 = smov 7   ;;  %vm1068_vm9 = vcmask 48128   ;;  %vm1112_vm10 = vcmask 457728   ;;  %vm1157_vm11 = vcmask 449536  }
  0x29   : > { %s2536_s23 = scalar_lea.vmem %s3069_s0, %s2152_s20  ;;  %s2399_s18 = smov 6   ;;  %vm845_vm12 = vcmask 146432   ;;  %vm890_vm13 = vcmask 138240   ;;  %vm934_vm14 = vcmask 130048   ;;  %vm979_vm15 = vcmask 64512  }
  0x2a   : > { %v1387_v6 = vld [vmem:[%s2536_s23 + $0x2] sm:$0xff]  ;;  %v2237_v15 = vld [vmem:[%s2536_s23 + $0xa] ss:$0 sps:$4 sm:$0x33]   ;;  %s2400_s19 = smov 56   ;;  %s2401_s20 = smov 55  }
  0x2b   : > { %v2540_v7 = vrot.slane %v1387_v6, %v2531_v5  ;;  %v1391_v8 = vcombine.low %v1387_v6, %v1387_v6  ;;  %v1347_v9 = vcombine.high %v1387_v6, %v1387_v6  ;;  %v1413_v16 = vrot.slane %v2237_v15, %v2531_v5  ;;  %v2096_v17 = vld.sshfl [vmem:[%s2536_s23 + $0xa] sm:$0x3 pattern:$0x76325410]  ;;  %v987_v18 = vld [vmem:[%s2536_s23] sm:$0xff]  ;;  %s2402_s21 = smov 18  }
  0x2c   : > { %v2572_v19 = vrot.slane %v987_v18, %v2531_v5  ;;  %v1035_v20 = vcombine.low %v987_v18, %v987_v18  ;;  %v991_v21 = vcombine.high %v987_v18, %v987_v18  ;;  %v2240_v24 = vld [vmem:[%s2536_s23 + $0xa] ss:$0 sps:$4 sm:$0x33]   ;;  %s2403_s22 = smov 17   ;;  %v297_v52 = vld [vmem:[%s2536_s23] sm:$0xff] }
  0x2d   : > { %1416 = vrot.lane.b32.xlu1 %v2540_v7, %s2390_s29  ;;  %1369 = vrot.lane.b32.xlu0 %v2540_v7, %s2391_s8  ;;  %v1398_v10 = vrot.slane %v1391_v8, %v2531_v5  ;;  %v1450_v11 = vrot.slane %v1347_v9, %v2531_v5  ;;  %v1235_v25 = vrot.slane %v2240_v24, %v2531_v5  ;;  %v2241_v26 = vld [vmem:[%s2536_s23 + $0xa] ss:$0 sps:$4 sm:$0x33]   ;;  %v2242_v28 = vld [vmem:[%s2536_s23 + $0x8] ss:$0 sps:$4 sm:$0x33]  }
  0x2e   : > { %v2578_v22 = vrot.slane %v1035_v20, %v2531_v5  ;;  %v2581_v23 = vrot.slane %v991_v21, %v2531_v5  ;;  %v1324_v27 = vrot.slane %v2241_v26, %v2531_v5  ;;  %v2619_v29 = vld.sshfl [vmem:[%s2536_s23 + $0x8] sm:$0x3 pattern:$0x76325410]  ;;  %v1057_v30 = vrot.slane %v2242_v28, %v2531_v5 }
  0x2f   : > { %v2243_v31 = vld [vmem:[%s2536_s23 + $0xa] ss:$0 sps:$4 sm:$0x33]   ;;  %v2244_v33 = vld [vmem:[%s2536_s23 + $0x8] ss:$0 sps:$4 sm:$0x33]   ;;  %v299_v24 = vcombine.high %v297_v52, %v297_v52 }
  0x30   : > { %v1146_v32 = vrot.slane %v2243_v31, %v2531_v5  ;;  %v879_v34 = vrot.slane %v2244_v33, %v2531_v5  ;;  %v2245_v35 = vld [vmem:[%s2536_s23 + $0x8] ss:$0 sps:$4 sm:$0x33]  }
  0x31   : > { %1414 = vrot.lane.b32.xlu1 %v1398_v10, %s2390_s29  ;;  %1458 = vrot.lane.b32.xlu0 %v2540_v7, %s2392_s9  ;;  %v968_v36 = vrot.slane %v2245_v35, %v2531_v5  ;;  %v2246_v39 = vld [vmem:[%s2536_s23 + $0x8] ss:$0 sps:$4 sm:$0x33]  }
  0x32   : > { %v701_v44 = vrot.slane %v2246_v39, %v2531_v5  ;;  %v2247_v45 = vld [vmem:[%s2536_s23 + $0x8] ss:$0 sps:$4 sm:$0x33]  }
  0x33   : > { %v790_v53 = vrot.slane %v2247_v45, %v2531_v5  ;;  %2083 = vst.sshfl [vmem:[#allocation2] sm:$0xf pattern:$0x76325410] %v297_v52 }
  0x34   : > { %v2251_v14 = vld [vmem:[%s2536_s23 + $0x8] ss:$0 sps:$4 sm:$0x33]  }
  0x35   : > { %1460 = vrot.lane.b32.xlu1 %v1450_v11, %s2392_s9  ;;  %1191 = vrot.lane.b32.xlu0 %v2540_v7, %s2393_s13  ;;  %v2252_v26 = vld [vmem:[%s2536_s23 + $0x8] ss:$0 sps:$4 sm:$0x33]  }
  0x36   : > { %2084 = vst.sshfl [vmem:[#allocation2 + $0x8] sm:$0xf pattern:$0x76325410] %v299_v24 }
  0x39   : > { %1371 = vrot.lane.b32.xlu0 %v1450_v11, %s2391_s8  ;;  %1193 = vrot.lane.b32.xlu1 %v1450_v11, %s2393_s13 }
  0x3d   : > { %1236 = vrot.lane.b32.xlu0 %v1398_v10, %s2395_s14  ;;  %1238 = vrot.lane.b32.xlu1 %v2540_v7, %s2395_s14 }
  0x41   : > { %1280 = vrot.lane.b32.xlu0 %v2540_v7, %s2396_s15  ;;  %1282 = vrot.lane.b32.xlu1 %v1450_v11, %s2396_s15 }
  0x45   : > { %1325 = vrot.lane.b32.xlu0 %v1398_v10, %s2397_s16  ;;  %1327 = vrot.lane.b32.xlu1 %v2540_v7, %s2397_s16 }
  0x49   : > { %1373 = vrot.lane.b32.xlu0 %v2096_v17, %s2391_s8  ;;  %1418 = vrot.lane.b32.xlu1 %v1413_v16, %s2390_s29  ;;  %s2404_s29 = smov 16   ;;  %s2405_s8 = smov 8  }
  0x4d   : > { %1462 = vrot.lane.b32.xlu0 %v2096_v17, %s2392_s9  ;;  %1013 = vrot.lane.b32.xlu1 %v2572_v19, %s2398_s17  ;;  %s2406_s9 = smov 106  }
  0x51   : > { %1058 = vrot.lane.b32.xlu1 %v2578_v22, %s2399_s18  ;;  %1015 = vrot.lane.b32.xlu0 %v2581_v23, %s2398_s17 }
  0x55   : > { %1102 = vrot.lane.b32.xlu1 %v2540_v7, %s2400_s19  ;;  %1060 = vrot.lane.b32.xlu0 %v2572_v19, %s2399_s18 }
  0x59   : > { %1147 = vrot.lane.b32.xlu1 %v1398_v10, %s2401_s20  ;;  %1104 = vrot.lane.b32.xlu0 %v1450_v11, %s2400_s19 }
  0x5d   : > { %1195 = vrot.lane.b32.xlu1 %v2096_v17, %s2393_s13  ;;  %1149 = vrot.lane.b32.xlu0 %v2540_v7, %s2401_s20  ;;  %s2407_s13 = smov 28  }
  0x61   : > { %1284 = vrot.lane.b32.xlu1 %v2096_v17, %s2396_s15  ;;  %1240 = vrot.lane.b32.xlu0 %v1235_v25, %s2395_s14  ;;  %s2408_s14 = smov 27   ;;  %s2409_s15 = smov 26   ;;  %v523_v25 = vrot.slane %v2251_v14, %v2531_v5 }
  0x65   : > { %1329 = vrot.lane.b32.xlu0 %v1324_v27, %s2397_s16  ;;  %835 = vrot.lane.b32.xlu1 %v2572_v19, %s2402_s21  ;;  %s2410_s16 = smov 117   ;;  %v2253_v27 = vld [vmem:[%s2536_s23 + $0x8] ss:$0 sps:$4 sm:$0x33]  }
  0x66   : > { %v344_v35 = vrot.slane %v2253_v27, %v2531_v5 }
  0x69   : > { %880 = vrot.lane.b32.xlu1 %v2578_v22, %s2403_s22  ;;  %837 = vrot.lane.b32.xlu0 %v2581_v23, %s2402_s21 }
  0x6d   : > { %924 = vrot.lane.b32.xlu1 %v2572_v19, %s2404_s29  ;;  %882 = vrot.lane.b32.xlu0 %v2572_v19, %s2403_s22 }
  0x71   : > { %969 = vrot.lane.b32.xlu1 %v2578_v22, %s2405_s8  ;;  %926 = vrot.lane.b32.xlu0 %v2581_v23, %s2404_s29 }
  0x75   : > { %1017 = vrot.lane.b32.xlu1 %v2619_v29, %s2398_s17  ;;  %971 = vrot.lane.b32.xlu0 %v2572_v19, %s2405_s8  ;;  %s2411_s17 = smov 116  }
  0x79   : > { %1106 = vrot.lane.b32.xlu1 %v2096_v17, %s2400_s19  ;;  %1062 = vrot.lane.b32.xlu0 %v1057_v30, %s2399_s18  ;;  %s2412_s18 = smov 108   ;;  %s2413_s19 = smov 107  }
  0x7d   : > { %1151 = vrot.lane.b32.xlu0 %v1146_v32, %s2401_s20  ;;  %657 = vrot.lane.b32.xlu1 %v2572_v19, %s2406_s9  ;;  %s2414_s20 = smov 127  }
  0x81   : > { %702 = vrot.lane.b32.xlu1 %v2578_v22, %s2407_s13  ;;  %659 = vrot.lane.b32.xlu0 %v2581_v23, %s2406_s9 }
  0x85   : > { %746 = vrot.lane.b32.xlu1 %v2572_v19, %s2408_s14  ;;  %704 = vrot.lane.b32.xlu0 %v2572_v19, %s2407_s13 }
  0x89   : > { %791 = vrot.lane.b32.xlu1 %v2578_v22, %s2409_s15  ;;  %748 = vrot.lane.b32.xlu0 %v2581_v23, %s2408_s14 }
  0x8d   : > { %839 = vrot.lane.b32.xlu1 %v2619_v29, %s2402_s21  ;;  %793 = vrot.lane.b32.xlu0 %v2572_v19, %s2409_s15  ;;  %s2415_s21 = smov 126  }
  0x91   : > { %928 = vrot.lane.b32.xlu1 %v2619_v29, %s2404_s29  ;;  %884 = vrot.lane.b32.xlu0 %v879_v34, %s2403_s22  ;;  %s2416_s22 = smov 118   ;;  %v612_v34 = vrot.slane %v2252_v26, %v2531_v5 }
  0x95   : > { %973 = vrot.lane.b32.xlu0 %v968_v36, %s2405_s8  ;;  %479 = vrot.lane.b32.xlu1 %v2572_v19, %s2410_s16  ;;  %v2254_v36 = vld [vmem:[%s2536_s23 + $0x8] ss:$0 sps:$4 sm:$0x33]  }
  0x99   : > { %524 = vrot.lane.b32.xlu1 %v2578_v22, %s2411_s17  ;;  %481 = vrot.lane.b32.xlu0 %v2581_v23, %s2410_s16 }
  0x9d   : > { %568 = vrot.lane.b32.xlu1 %v2572_v19, %s2412_s18  ;;  %526 = vrot.lane.b32.xlu0 %v2572_v19, %s2411_s17 }
  0x9f   : > { %v2667_v37 = vpop.permute.xlu1 %1416  ;;  %v1370_v38 = vpop.permute.xlu0 %1369 }
  0xa0   : > { %v1421_v42 = vrot.slane %v2667_v37, 4  ;;  %v1375_v58 = vrot.slane %v1370_v38, 4 }
  0xa1   : > { %613 = vrot.lane.b32.xlu1 %v2578_v22, %s2413_s19  ;;  %570 = vrot.lane.b32.xlu0 %v2581_v23, %s2412_s18 }
  0xa3   : > { %v1415_v40 = vpop.permute.xlu1 %1414  ;;  %v1459_v41 = vpop.permute.xlu0 %1458 }
  0xa4   : > { %v1420_v43 = vrot.slane %v1415_v40, 4  ;;  %v1464_v50 = vrot.slane %v1459_v41, 4 }
  0xa5   : > { %661 = vrot.lane.b32.xlu1 %v2619_v29, %s2406_s9  ;;  %615 = vrot.lane.b32.xlu0 %v2572_v19, %s2413_s19 }
  0xa6   : > { %v1423_v46 = vsel %vm354_vm0, %v1420_v43, %v1421_v42 }
  0xa7   : > { %v1425_v47 = vsel %vm1424_vm1, %v1415_v40, %v1423_v46  ;;  %v2685_v48 = vpop.permute.xlu1 %1460  ;;  %v1192_v49 = vpop.permute.xlu0 %1191  ;;  %v434_v46 = vrot.slane %v2254_v36, %v2531_v5 }
  0xa8   : > { %1430 = vst [vmem:[#allocation2 + $0xc0] sm:$0xcc] %v1425_v47  ;;  %v1465_v51 = vrot.slane %v2685_v48, 4  ;;  %v1197_v59 = vrot.slane %v1192_v49, 4 }
  0xa9   : > { %750 = vrot.lane.b32.xlu1 %v2619_v29, %s2408_s14  ;;  %706 = vrot.lane.b32.xlu0 %v701_v44, %s2407_s13  ;;  %s2419_s14 = smov [#allocation6]  }
  0xaa   : > { %v1467_v54 = vsel %vm354_vm0, %v1464_v50, %v1465_v51 }
  0xab   : > { %v1469_v55 = vsel %vm1468_vm2, %v1459_v41, %v1467_v54  ;;  %v2697_v56 = vpop.permute.xlu0 %1371  ;;  %v2699_v57 = vpop.permute.xlu1 %1193 }
  0xac   : > { %1474 = vst [vmem:[#allocation2 + $0xd0] sm:$0x33] %v1469_v55  ;;  %v1376_v60 = vrot.slane %v2697_v56, 4  ;;  %v1198_v61 = vrot.slane %v2699_v57, 4 }
  0xad   : > { %795 = vrot.lane.b32.xlu0 %v790_v53, %s2409_s15  ;;  %345 = vrot.lane.b32.xlu1 %v2578_v22, %s2414_s20  ;;  %s2326_s15 = sshll.u32 %s2419_s14, 4  ;;  %s2327_s15 = int_to_ptr.vmem [resolvable:$false] %s2326_s15 }
  0xae   : > { %v1378_v62 = vsel %vm354_vm0, %v1375_v58, %v1376_v60  ;;  %v1200_v63 = vsel %vm354_vm0, %v1197_v59, %v1198_v61 }
  0xaf   : > { %v1380_v0 = vsel %vm1379_vm3, %v1370_v38, %v1378_v62  ;;  %v1202_v1 = vsel %vm1201_vm4, %v1192_v49, %v1200_v63  ;;  %v1237_v2 = vpop.permute.xlu0 %1236  ;;  %v2714_v4 = vpop.permute.xlu1 %1238 }
  0xb0   : > { %1385 = vst [vmem:[#allocation2 + $0xc0] sm:$0x33] %v1380_v0  ;;  %1207 = vst [vmem:[#allocation2 + $0xa0] sm:$0x33] %v1202_v1  ;;  %v1242_v6 = vrot.slane %v1237_v2, 4  ;;  %v1243_v7 = vrot.slane %v2714_v4, 4 }
  0xb1   : > { %347 = vrot.lane.b32.xlu0 %v2572_v19, %s2414_s20  ;;  %390 = vrot.lane.b32.xlu1 %v2572_v19, %s2415_s21 }
  0xb2   : > { %v1245_v8 = vsel %vm354_vm0, %v1242_v6, %v1243_v7 }
  0xb3   : > { %v1247_v9 = vsel %vm1246_vm5, %v1237_v2, %v1245_v8  ;;  %v1281_v10 = vpop.permute.xlu0 %1280  ;;  %v2725_v11 = vpop.permute.xlu1 %1282 }
  0xb4   : > { %1252 = vst [vmem:[#allocation2 + $0xa0] sm:$0xcc] %v1247_v9  ;;  %v1286_v12 = vrot.slane %v1281_v10, 4  ;;  %v1287_v13 = vrot.slane %v2725_v11, 4 }
  0xb5   : > { %392 = vrot.lane.b32.xlu0 %v2581_v23, %s2415_s21  ;;  %435 = vrot.lane.b32.xlu1 %v2578_v22, %s2416_s22 }
  0xb6   : > { %v1289_v15 = vsel %vm354_vm0, %v1286_v12, %v1287_v13 }
  0xb7   : > { %v1291_v16 = vsel %vm1290_vm6, %v1281_v10, %v1289_v15  ;;  %v1326_v17 = vpop.permute.xlu0 %1325  ;;  %v2737_v18 = vpop.permute.xlu1 %1327  ;;  %v2248_v20 = vld [vmem:[#allocation2 + $0xc4] ss:$16 sps:$4 sm:$0xff]   ;;  %v2250_v21 = vld [vmem:[#allocation2 + $0xc0] ss:$16 sps:$4 sm:$0xff]  }
  0xb8   : > { %1296 = vst [vmem:[#allocation2 + $0xb0] sm:$0x33] %v1291_v16  ;;  %v1331_v23 = vrot.slane %v1326_v17, 4  ;;  %v1332_v22 = vrot.slane %v2737_v18, 4  ;;  %1677 = vmatprep.subr.bf16.mxu0 %v2248_v20 }
  0xb9   : > { %437 = vrot.lane.b32.xlu0 %v2572_v19, %s2416_s22  ;;  %483 = vrot.lane.b32.xlu1 %v2619_v29, %s2410_s16  ;;  %s2328_s16 = scalar_lea.vmem %s2327_s15, 1024 }
  0xba   : > { %v1334_v28 = vsel %vm354_vm0, %v1331_v23, %v1332_v22  ;;  %1678 = vmatpush1.bf16.msra.mxu0 %v2250_v21 }
  0xbb   : > { %v1336_v30 = vsel %vm1335_vm7, %v1326_v17, %v1334_v28  ;;  %v1374_v31 = vpop.permute.xlu0 %1373  ;;  %v1419_v32 = vpop.permute.xlu1 %1418 }
  0xbc   : > { %1341 = vst [vmem:[#allocation2 + $0xb0] sm:$0xcc] %v1336_v30  ;;  %v1377_v19 = vrot.slane %v1374_v31, 4  ;;  %v1422_v33 = vrot.slane %v1419_v32, 4 }
  0xbd   : > { %528 = vrot.lane.b32.xlu0 %v523_v25, %s2411_s17  ;;  %572 = vrot.lane.b32.xlu1 %v2619_v29, %s2412_s18 }
  0xbe   : > { %v1381_v38 = vsel %vm354_vm0, %v1376_v60, %v1377_v19  ;;  %v1426_v39 = vsel %vm354_vm0, %v1421_v42, %v1422_v33 }
  0xbf   : > { %v1382_v40 = vsel %vm1379_vm3, %v2697_v56, %v1381_v38  ;;  %v1427_v41 = vsel %vm1424_vm1, %v2667_v37, %v1426_v39  ;;  %v1463_v43 = vpop.permute.xlu0 %1462  ;;  %v1014_v44 = vpop.permute.xlu1 %1013  ;;  %vm667_vm1 = vcmask 867328   ;;  %vm756_vm3 = vcmask 220160  }
  0xc0   : > { %1386 = vst [vmem:[#allocation2 + $0xc8] sm:$0x33] %v1382_v40  ;;  %1431 = vst [vmem:[#allocation2 + $0xc8] sm:$0xcc] %v1427_v41  ;;  %v1466_v45 = vrot.slane %v1463_v43, 4  ;;  %v1019_v53 = vrot.slane %v1014_v44, 4 }
  0xc1   : > { %617 = vrot.lane.b32.xlu0 %v612_v34, %s2413_s19  ;;  %349 = vrot.lane.b32.xlu1 %v344_v35, %s2414_s20  ;;  %s282_s19 = sand.u32 1, %s2378_s25  }
  0xc2   : > { %v1470_v42 = vsel %vm354_vm0, %v1465_v51, %v1466_v45  ;;  %s2081_s20 = sshll.u32 %s282_s19, 5 }
  0xc3   : > { %v1471_v47 = vsel %vm1468_vm2, %v2685_v48, %v1470_v42  ;;  %v1059_v49 = vpop.permute.xlu1 %1058  ;;  %v2775_v37 = vpop.permute.xlu0 %1015  ;;  %v2255_v50 = vld [vmem:[#allocation2 + $0xa4] ss:$16 sps:$4 sm:$0xff]   ;;  %v2257_v52 = vld [vmem:[#allocation2 + $0xa0] ss:$16 sps:$4 sm:$0xff]   ;;  %vm712_vm2 = vcmask 228352  }
  0xc4   : > { %1475 = vst [vmem:[#allocation2 + $0xd8] sm:$0x33] %v1471_v47  ;;  %v1020_v54 = vrot.slane %v2775_v37, 4  ;;  %1679 = vmatprep.subr.bf16.mxu0 %v2255_v50  ;;  %v1064_v56 = vrot.slane %v1059_v49, 4 }
  0xc5   : > { %394 = vrot.lane.b32.xlu0 %v2619_v29, %s2415_s21  ;;  %439 = vrot.lane.b32.xlu1 %v434_v46, %s2416_s22  ;;  %v1509_v29 = vld [vmem:[%s3071_s2] sm:$0xff]  ;;  %s2137_s21 = sshll.u32 %s2481_s28, 9  ;;  %s284_s22 = scalar_lea.vmem [#allocation6], %s2081_s20 }
  0xc6   : > { %v1022_v5 = vsel %vm354_vm0, %v1019_v53, %v1020_v54  ;;  %1680 = vmatpush1.bf16.msra.mxu0 %v2257_v52  ;;  %s2004_s23 = sshll.u32 %s284_s22, 4  ;;  %s3028_s9 = scalar_lea.hbm %s3076_s7, %s2137_s21  ;;  %s3030_s23 = int_to_ptr.vmem [resolvable:$true] %s2004_s23 }
  0xc7   : > { %v1024_v48 = vsel %vm1023_vm8, %v1014_v44, %v1022_v5  ;;  %v1103_v51 = vpop.permute.xlu1 %1102  ;;  %v2785_v55 = vpop.permute.xlu0 %1060  ;;  %s1990_s28 = scalar_lea.sflag [#allocation5], %s282_s19  ;;  %s2322_s13 = scalar_lea.vmem %s3030_s23, 512 }
  0xc8   : > { %1029 = vst [vmem:[#allocation2 + $0x80] sm:$0x33] %v1024_v48  ;;  %v1065_v58 = vrot.slane %v2785_v55, 4  ;;  %v1108_v2 = vrot.slane %v1103_v51, 4  ;;  %p2323_p6 = scmp.ne.s32.totalorder %s3030_s23, %s2322_s13  ;;  %p2329_p11 = scmp.lt.s32.totalorder %s3030_s23, %s2327_s15 }
  0xc9   : > { %1512 = vperm.xlu0 %2233, %v1509_v29   ;;  %p2330_p12 = scmp.lt.s32.totalorder %s2328_s16, %s2322_s13 }
  0xca   : > { %v1067_v59 = vsel %vm354_vm0, %v1064_v56, %v1065_v58  ;;  %p2324_p9 = pnand %p2323_p6, %p2498_p5 }
  0xcb   : > { %v1069_v60 = vsel %vm1068_vm9, %v1059_v49, %v1067_v59  ;;  %v1148_v62 = vpop.permute.xlu1 %1147  ;;  %v2795_v63 = vpop.permute.xlu0 %1104  ;;  %v2258_v0 = vld [vmem:[#allocation2 + $0xcc] ss:$16 sps:$4 sm:$0xff]   ;;  %v2260_v1 = vld [vmem:[#allocation2 + $0xc8] ss:$16 sps:$4 sm:$0xff]   ;;  %p2331_p13 = por %p2330_p12, %p2329_p11 }
  0xcc   : > { %1074 = vst [vmem:[#allocation2 + $0x80] sm:$0xcc] %v1069_v60  ;;  %v1109_v6 = vrot.slane %v2795_v63, 4  ;;  %1718 = vmatprep.subr.bf16.mxu1 %v2258_v0  ;;  %v1153_v14 = vrot.slane %v1148_v62, 4  ;;  %p2325_p10 = pneg %p2324_p9 }
  0xcd   : > { %1719 = vmatpush1.bf16.msra.mxu1 %v2260_v1 }
  0xce   : > { %v1111_v8 = vsel %vm354_vm0, %v1108_v2, %v1109_v6  ;;  %p2332_p0 = pnand %p2331_p13, %p2325_p10 }
  0xcf   : > { %v1113_v9 = vsel %vm1112_vm10, %v1103_v51, %v1111_v8  ;;  %v1196_v10 = vpop.permute.xlu1 %1195  ;;  %v2802_v12 = vpop.permute.xlu0 %1149 }
  0xd0   : > { %1118 = vst [vmem:[#allocation2 + $0x90] sm:$0x33] %v1113_v9  ;;  %v1199_v15 = vrot.slane %v1196_v10, 4  ;;  %v1154_v16 = vrot.slane %v2802_v12, 4 }
  0xd2   : > { %v1203_v17 = vsel %vm354_vm0, %v1198_v61, %v1199_v15  ;;  %v1156_v20 = vsel %vm354_vm0, %v1153_v14, %v1154_v16 }
  0xd3   : > { %v1204_v21 = vsel %vm1201_vm4, %v2699_v57, %v1203_v17  ;;  %v1158_v24 = vsel %vm1157_vm11, %v1148_v62, %v1156_v20  ;;  %v1285_v23 = vpop.permute.xlu1 %1284  ;;  %v1241_v25 = vpop.permute.xlu0 %1240  ;;  %vm801_vm4 = vcmask 211968  }
  0xd4   : > { %1208 = vst [vmem:[#allocation2 + $0xa8] sm:$0x33] %v1204_v21  ;;  %1163 = vst [vmem:[#allocation2 + $0x90] sm:$0xcc] %v1158_v24  ;;  %v1288_v26 = vrot.slane %v1285_v23, 4  ;;  %v1244_v27 = vrot.slane %v1241_v25, 4 }
  0xd6   : > { %v1292_v28 = vsel %vm354_vm0, %v1287_v13, %v1288_v26  ;;  %v1248_v61 = vsel %vm354_vm0, %v1243_v7, %v1244_v27 }
  0xd7   : > { %v1293_v30 = vsel %vm1290_vm6, %v2725_v11, %v1292_v28  ;;  %v1249_v57 = vsel %vm1246_vm5, %v2714_v4, %v1248_v61  ;;  %v1330_v31 = vpop.permute.xlu0 %1329  ;;  %v836_v32 = vpop.permute.xlu1 %835  ;;  %vm489_vm5 = vcmask 957440   ;;  %vm534_vm6 = vcmask 949248  }
  0xd8   : > { %1297 = vst [vmem:[#allocation2 + $0xb8] sm:$0x33] %v1293_v30  ;;  %1253 = vst [vmem:[#allocation2 + $0xa8] sm:$0xcc] %v1249_v57  ;;  %v1333_v19 = vrot.slane %v1330_v31, 4  ;;  %v841_v36 = vrot.slane %v836_v32, 4 }
  0xda   : > { %v1337_v33 = vsel %vm354_vm0, %v1332_v22, %v1333_v19 }
  0xdb   : > { %v1338_v13 = vsel %vm1335_vm7, %v2737_v18, %v1337_v33  ;;  %v881_v34 = vpop.permute.xlu1 %880  ;;  %v2829_v7 = vpop.permute.xlu0 %837  ;;  %v2261_v35 = vld [vmem:[#allocation2 + $0x84] ss:$16 sps:$4 sm:$0xff]   ;;  %v2263_v11 = vld [vmem:[#allocation2 + $0x80] ss:$16 sps:$4 sm:$0xff]   ;;  %vm578_vm7 = vcmask 883712  }
  0xdc   : > { %1342 = vst [vmem:[#allocation2 + $0xb8] sm:$0xcc] %v1338_v13  ;;  %v842_v4 = vrot.slane %v2829_v7, 4  ;;  %1681 = vmatprep.subr.bf16.mxu0 %v2261_v35  ;;  %v886_v40 = vrot.slane %v881_v34, 4 }
  0xdd   : > { %1682 = vmatpush1.bf16.msra.mxu0 %v2263_v11 }
  0xde   : > { %v844_v38 = vsel %vm354_vm0, %v841_v36, %v842_v4 }
  0xdf   : > { %v846_v22 = vsel %vm845_vm12, %v836_v32, %v844_v38  ;;  %v925_v39 = vpop.permute.xlu1 %924  ;;  %v2836_v18 = vpop.permute.xlu0 %882 }
  0xe0   : > { %851 = vst [vmem:[#allocation2 + $0x60] sm:$0x33] %v846_v22  ;;  %v887_v41 = vrot.slane %v2836_v18, 4  ;;  %v930_v49 = vrot.slane %v925_v39, 4 }
  0xe2   : > { %v889_v43 = vsel %vm354_vm0, %v886_v40, %v887_v41 }
  0xe3   : > { %v891_v44 = vsel %vm890_vm13, %v881_v34, %v889_v43  ;;  %v970_v45 = vpop.permute.xlu1 %969  ;;  %v2843_v46 = vpop.permute.xlu0 %926  ;;  %v2264_v42 = vld [vmem:[#allocation2 + $0xac] ss:$16 sps:$4 sm:$0xff]   ;;  %v2266_v47 = vld [vmem:[#allocation2 + $0xa8] ss:$16 sps:$4 sm:$0xff]  }
  0xe4   : > { %896 = vst [vmem:[#allocation2 + $0x60] sm:$0xcc] %v891_v44  ;;  %v931_v50 = vrot.slane %v2843_v46, 4  ;;  %1720 = vmatprep.subr.bf16.mxu1 %v2264_v42  ;;  %v975_v51 = vrot.slane %v970_v45, 4 }
  0xe5   : > { %1721 = vmatpush1.bf16.msra.mxu1 %v2266_v47 }
  0xe6   : > { %v933_v52 = vsel %vm354_vm0, %v930_v49, %v931_v50 }
  0xe7   : > { %v935_v53 = vsel %vm934_vm14, %v925_v39, %v933_v52  ;;  %v1018_v5 = vpop.permute.xlu1 %1017  ;;  %v2850_v48 = vpop.permute.xlu0 %971 }
  0xe8   : > { %940 = vst [vmem:[#allocation2 + $0x70] sm:$0x33] %v935_v53  ;;  %v1021_v56 = vrot.slane %v1018_v5, 4  ;;  %v976_v29 = vrot.slane %v2850_v48, 4 }
  0xea   : > { %v1025_v59 = vsel %vm354_vm0, %v1020_v54, %v1021_v56  ;;  %v978_v60 = vsel %vm354_vm0, %v975_v51, %v976_v29 }
  0xeb   : > { %v1026_v62 = vsel %vm1023_vm8, %v2775_v37, %v1025_v59  ;;  %v980_v0 = vsel %vm979_vm15, %v970_v45, %v978_v60  ;;  %v1107_v1 = vpop.permute.xlu1 %1106  ;;  %v1063_v2 = vpop.permute.xlu0 %1062  ;;  %vm623_vm8 = vcmask 875520  }
  0xec   : > { %1030 = vst [vmem:[#allocation2 + $0x88] sm:$0x33] %v1026_v62  ;;  %985 = vst [vmem:[#allocation2 + $0x70] sm:$0xcc] %v980_v0  ;;  %v1110_v8 = vrot.slane %v1107_v1, 4  ;;  %v1066_v9 = vrot.slane %v1063_v2, 4 }
  0xee   : > { %v1114_v10 = vsel %vm354_vm0, %v1109_v6, %v1110_v8  ;;  %v1070_v54 = vsel %vm354_vm0, %v1065_v58, %v1066_v9 }
  0xef   : > { %v1115_v14 = vsel %vm1112_vm10, %v2795_v63, %v1114_v10  ;;  %v1071_v37 = vsel %vm1068_vm9, %v2785_v55, %v1070_v54  ;;  %v1152_v15 = vpop.permute.xlu0 %1151  ;;  %v658_v17 = vpop.permute.xlu1 %657  ;;  %vm356_vm9 = vcmask 1039360   ;;  %vm400_vm10 = vcmask 1031168  }
  0xf0   : > { %1119 = vst [vmem:[#allocation2 + $0x98] sm:$0x33] %v1115_v14  ;;  %1075 = vst [vmem:[#allocation2 + $0x88] sm:$0xcc] %v1071_v37  ;;  %v1155_v20 = vrot.slane %v1152_v15, 4  ;;  %v663_v25 = vrot.slane %v658_v17, 4 }
  0xf2   : > { %v1159_v21 = vsel %vm354_vm0, %v1154_v16, %v1155_v20 }
  0xf3   : > { %v1160_v6 = vsel %vm1157_vm11, %v2802_v12, %v1159_v21  ;;  %v703_v24 = vpop.permute.xlu1 %702  ;;  %v2877_v58 = vpop.permute.xlu0 %659  ;;  %v2267_v23 = vld [vmem:[#allocation2 + $0x64] ss:$16 sps:$4 sm:$0xff]   ;;  %v2269_v63 = vld [vmem:[#allocation2 + $0x60] ss:$16 sps:$4 sm:$0xff]   ;;  %vm445_vm11 = vcmask 965632  }
  0xf4   : > { %1164 = vst [vmem:[#allocation2 + $0x98] sm:$0xcc] %v1160_v6  ;;  %v664_v55 = vrot.slane %v2877_v58, 4  ;;  %1683 = vmatprep.subr.bf16.mxu0 %v2267_v23  ;;  %v708_v28 = vrot.slane %v703_v24, 4 }
  0xf5   : > { %1684 = vmatpush1.bf16.msra.mxu0 %v2269_v63 }
  0xf6   : > { %v666_v26 = vsel %vm354_vm0, %v663_v25, %v664_v55 }
  0xf7   : > { %v668_v16 = vsel %vm667_vm1, %v658_v17, %v666_v26  ;;  %v747_v27 = vpop.permute.xlu1 %746  ;;  %v2884_v12 = vpop.permute.xlu0 %704 }
  0xf8   : > { %673 = vst [vmem:[#allocation2 + $0x40] sm:$0x33] %v668_v16  ;;  %v709_v61 = vrot.slane %v2884_v12, 4  ;;  %v752_v13 = vrot.slane %v747_v27, 4 }
  0xfa   : > { %v711_v30 = vsel %vm354_vm0, %v708_v28, %v709_v61 }
  0xfb   : > { %v713_v57 = vsel %vm712_vm2, %v703_v24, %v711_v30  ;;  %v792_v31 = vpop.permute.xlu1 %791  ;;  %v2891_v32 = vpop.permute.xlu0 %748  ;;  %v2270_v19 = vld [vmem:[#allocation2 + $0x8c] ss:$16 sps:$4 sm:$0xff]   ;;  %v2272_v33 = vld [vmem:[#allocation2 + $0x88] ss:$16 sps:$4 sm:$0xff]  }
  0xfc   : > { %718 = vst [vmem:[#allocation2 + $0x40] sm:$0xcc] %v713_v57  ;;  %v753_v34 = vrot.slane %v2891_v32, 4  ;;  %1722 = vmatprep.subr.bf16.mxu1 %v2270_v19  ;;  %v797_v22 = vrot.slane %v792_v31, 4 }
  0xfd   : > { %1723 = vmatpush1.bf16.msra.mxu1 %v2272_v33 }
  0xfe   : > { %v755_v35 = vsel %vm354_vm0, %v752_v13, %v753_v34 }
  0xff   : > { %v757_v11 = vsel %vm756_vm3, %v747_v27, %v755_v35  ;;  %v840_v36 = vpop.permute.xlu1 %839  ;;  %v2898_v38 = vpop.permute.xlu0 %793 }
 0x100   : > { %762 = vst [vmem:[#allocation2 + $0x50] sm:$0x33] %v757_v11  ;;  %v843_v39 = vrot.slane %v840_v36, 4  ;;  %v798_v40 = vrot.slane %v2898_v38, 4 }
 0x102   : > { %v847_v43 = vsel %vm354_vm0, %v842_v4, %v843_v39  ;;  %v800_v44 = vsel %vm354_vm0, %v797_v22, %v798_v40 }
 0x103   : > { %v848_v45 = vsel %vm845_vm12, %v2829_v7, %v847_v43  ;;  %v802_v42 = vsel %vm801_vm4, %v792_v31, %v800_v44  ;;  %v929_v47 = vpop.permute.xlu1 %928  ;;  %v885_v49 = vpop.permute.xlu0 %884 }
 0x104   : > { %852 = vst [vmem:[#allocation2 + $0x68] sm:$0x33] %v848_v45  ;;  %807 = vst [vmem:[#allocation2 + $0x50] sm:$0xcc] %v802_v42  ;;  %v932_v52 = vrot.slane %v929_v47, 4  ;;  %v888_v53 = vrot.slane %v885_v49, 4 }
 0x106   : > { %v936_v5 = vsel %vm354_vm0, %v931_v50, %v932_v52  ;;  %v892_v4 = vsel %vm354_vm0, %v887_v41, %v888_v53 }
 0x107   : > { %v937_v51 = vsel %vm934_vm14, %v2843_v46, %v936_v5  ;;  %v893_v7 = vsel %vm890_vm13, %v2836_v18, %v892_v4  ;;  %v974_v56 = vpop.permute.xlu0 %973  ;;  %v480_v59 = vpop.permute.xlu1 %479 }
 0x108   : > { %941 = vst [vmem:[#allocation2 + $0x78] sm:$0x33] %v937_v51  ;;  %897 = vst [vmem:[#allocation2 + $0x68] sm:$0xcc] %v893_v7  ;;  %v977_v60 = vrot.slane %v974_v56, 4  ;;  %v485_v2 = vrot.slane %v480_v59, 4 }
 0x10a   : > { %v981_v62 = vsel %vm354_vm0, %v976_v29, %v977_v60 }
 0x10b   : > { %v982_v50 = vsel %vm979_vm15, %v2850_v48, %v981_v62  ;;  %v525_v0 = vpop.permute.xlu1 %524  ;;  %v2925_v41 = vpop.permute.xlu0 %481  ;;  %v2273_v1 = vld [vmem:[#allocation2 + $0x44] ss:$16 sps:$4 sm:$0xff]   ;;  %v2275_v46 = vld [vmem:[#allocation2 + $0x40] ss:$16 sps:$4 sm:$0xff]  }
 0x10c   : > { %986 = vst [vmem:[#allocation2 + $0x78] sm:$0xcc] %v982_v50  ;;  %v486_v18 = vrot.slane %v2925_v41, 4  ;;  %1685 = vmatprep.subr.bf16.mxu0 %v2273_v1  ;;  %v530_v10 = vrot.slane %v525_v0, 4 }
 0x10d   : > { %1686 = vmatpush1.bf16.msra.mxu0 %v2275_v46 }
 0x10e   : > { %v488_v8 = vsel %vm354_vm0, %v485_v2, %v486_v18 }
 0x10f   : > { %v490_v29 = vsel %vm489_vm5, %v480_v59, %v488_v8  ;;  %v569_v9 = vpop.permute.xlu1 %568  ;;  %v2932_v48 = vpop.permute.xlu0 %526 }
 0x110   : > { %495 = vst [vmem:[#allocation2 + $0x20] sm:$0x33] %v490_v29  ;;  %v531_v54 = vrot.slane %v2932_v48, 4  ;;  %v574_v6 = vrot.slane %v569_v9, 4 }
 0x112   : > { %v533_v14 = vsel %vm354_vm0, %v530_v10, %v531_v54 }
 0x113   : > { %v535_v37 = vsel %vm534_vm6, %v525_v0, %v533_v14  ;;  %v614_v15 = vpop.permute.xlu1 %613  ;;  %v2939_v17 = vpop.permute.xlu0 %570  ;;  %v2276_v20 = vld [vmem:[#allocation2 + $0x6c] ss:$16 sps:$4 sm:$0xff]   ;;  %v2278_v21 = vld [vmem:[#allocation2 + $0x68] ss:$16 sps:$4 sm:$0xff]  }
 0x114   : > { %540 = vst [vmem:[#allocation2 + $0x20] sm:$0xcc] %v535_v37  ;;  %v575_v24 = vrot.slane %v2939_v17, 4  ;;  %1724 = vmatprep.subr.bf16.mxu1 %v2276_v20  ;;  %v619_v16 = vrot.slane %v614_v15, 4 }
 0x115   : > { %1725 = vmatpush1.bf16.msra.mxu1 %v2278_v21 }
 0x116   : > { %v577_v23 = vsel %vm354_vm0, %v574_v6, %v575_v24 }
 0x117   : > { %v579_v63 = vsel %vm578_vm7, %v569_v9, %v577_v23  ;;  %v662_v25 = vpop.permute.xlu1 %661  ;;  %v2946_v26 = vpop.permute.xlu0 %615 }
 0x118   : > { %584 = vst [vmem:[#allocation2 + $0x30] sm:$0x33] %v579_v63  ;;  %v665_v27 = vrot.slane %v662_v25, 4  ;;  %v620_v28 = vrot.slane %v2946_v26, 4 }
 0x11a   : > { %v669_v30 = vsel %vm354_vm0, %v664_v55, %v665_v27  ;;  %v622_v57 = vsel %vm354_vm0, %v619_v16, %v620_v28 }
 0x11b   : > { %v670_v31 = vsel %vm667_vm1, %v2877_v58, %v669_v30  ;;  %v624_v19 = vsel %vm623_vm8, %v614_v15, %v622_v57  ;;  %v751_v33 = vpop.permute.xlu1 %750  ;;  %v707_v13 = vpop.permute.xlu0 %706 }
 0x11c   : > { %674 = vst [vmem:[#allocation2 + $0x48] sm:$0x33] %v670_v31  ;;  %629 = vst [vmem:[#allocation2 + $0x30] sm:$0xcc] %v624_v19  ;;  %v754_v35 = vrot.slane %v751_v33, 4  ;;  %v710_v11 = vrot.slane %v707_v13, 4 }
 0x11d   : > { %v1476_v33 = vld [vmem:[#allocation3] sm:$0xf] }
 0x11e   : > { %v758_v36 = vsel %vm354_vm0, %v753_v34, %v754_v35  ;;  %v714_v55 = vsel %vm354_vm0, %v709_v61, %v710_v11 }
 0x11f   : > { %v759_v22 = vsel %vm756_vm3, %v2891_v32, %v758_v36  ;;  %v715_v58 = vsel %vm712_vm2, %v2884_v12, %v714_v55  ;;  %v796_v39 = vpop.permute.xlu0 %795  ;;  %v346_v43 = vpop.permute.xlu1 %345 }
 0x120   : > { %763 = vst [vmem:[#allocation2 + $0x58] sm:$0x33] %v759_v22  ;;  %719 = vst [vmem:[#allocation2 + $0x48] sm:$0xcc] %v715_v58  ;;  %v799_v44 = vrot.slane %v796_v39, 4  ;;  %v351_v32 = vrot.slane %v346_v43, 4 }
 0x121   : > { %v2417_v22 = vmov 0.0  }
 0x122   : > { %v803_v45 = vsel %vm354_vm0, %v798_v40, %v799_v44  ;;  %v1757_v44 = vld [vmem:[%s3075_s6] sm:$0xf] }
 0x123   : > { %v804_v34 = vsel %vm801_vm4, %v2898_v38, %v803_v45  ;;  %v348_v42 = vpop.permute.xlu0 %347  ;;  %v391_v61 = vpop.permute.xlu1 %390  ;;  %v2279_v47 = vld [vmem:[#allocation2 + $0x24] ss:$16 sps:$4 sm:$0xff]   ;;  %v2281_v49 = vld [vmem:[#allocation2 + $0x20] ss:$16 sps:$4 sm:$0xff]   ;;  %v1765_v45 = vsub.s32 1, %v2528_v3 }
 0x124   : > { %808 = vst [vmem:[#allocation2 + $0x58] sm:$0xcc] %v804_v34  ;;  %v352_v12 = vrot.slane %v348_v42, 4  ;;  %1687 = vmatprep.subr.bf16.mxu0 %v2279_v47  ;;  %v396_v40 = vrot.slane %v391_v61, 4 }
 0x125   : > { %1688 = vmatpush1.bf16.msra.mxu0 %v2281_v49 }
 0x126   : > { %v355_v52 = vsel %vm354_vm0, %v351_v32, %v352_v12 }
 0x127   : > { %v357_v53 = vsel %vm356_vm9, %v346_v43, %v355_v52  ;;  %v393_v5 = vpop.permute.xlu0 %392  ;;  %v436_v4 = vpop.permute.xlu1 %435  ;;  %v1761_v43 = vsub.s32 0, %v2528_v3  ;;  %v1766_v52 = vrot.slane %v1757_v44, %v1765_v45 }
 0x128   : > { %362 = vst [vmem:[#allocation2] sm:$0xcc] %v357_v53  ;;  %v397_v38 = vrot.slane %v393_v5, 4  ;;  %v441_v50 = vrot.slane %v436_v4, 4  ;;  %v1773_v53 = vsub.s32 3, %v2528_v3 }
 0x129   : > { %v1762_v47 = vrot.slane %v1757_v44, %v1761_v43 }
 0x12a   : > { %v399_v51 = vsel %vm354_vm0, %v396_v40, %v397_v38 }
 0x12b   : > { %v401_v7 = vsel %vm400_vm10, %v391_v61, %v399_v51  ;;  %v438_v56 = vpop.permute.xlu0 %437  ;;  %v484_v59 = vpop.permute.xlu1 %483  ;;  %v2282_v60 = vld [vmem:[#allocation2 + $0x4c] ss:$16 sps:$4 sm:$0xff]   ;;  %v2284_v62 = vld [vmem:[#allocation2 + $0x48] ss:$16 sps:$4 sm:$0xff]  }
 0x12c   : > { %406 = vst [vmem:[#allocation2 + $0x10] sm:$0x33] %v401_v7  ;;  %v442_v0 = vrot.slane %v438_v56, 4  ;;  %v487_v1 = vrot.slane %v484_v59, 4  ;;  %1726 = vmatprep.subr.bf16.mxu1 %v2282_v60  ;;  %v1774_v7 = vrot.slane %v1757_v44, %v1773_v53 }
 0x12d   : > { %1727 = vmatpush1.bf16.msra.mxu1 %v2284_v62 }
 0x12e   : > { %v444_v46 = vsel %vm354_vm0, %v441_v50, %v442_v0  ;;  %v491_v2 = vsel %vm354_vm0, %v486_v18, %v487_v1 }
 0x12f   : > { %v446_v8 = vsel %vm445_vm11, %v436_v4, %v444_v46  ;;  %v492_v29 = vsel %vm489_vm5, %v2925_v41, %v491_v2  ;;  %v529_v9 = vpop.permute.xlu0 %528  ;;  %v573_v10 = vpop.permute.xlu1 %572 }
 0x130   : > { %451 = vst [vmem:[#allocation2 + $0x10] sm:$0xcc] %v446_v8  ;;  %496 = vst [vmem:[#allocation2 + $0x28] sm:$0x33] %v492_v29  ;;  %v532_v14 = vrot.slane %v529_v9, 4  ;;  %v576_v37 = vrot.slane %v573_v10, 4 }
 0x132   : > { %v536_v15 = vsel %vm354_vm0, %v531_v54, %v532_v14  ;;  %v580_v18 = vsel %vm354_vm0, %v575_v24, %v576_v37 }
 0x133   : > { %v537_v20 = vsel %vm534_vm6, %v2932_v48, %v536_v15  ;;  %v581_v41 = vsel %vm578_vm7, %v2939_v17, %v580_v18  ;;  %v618_v21 = vpop.permute.xlu0 %617  ;;  %v350_v6 = vpop.permute.xlu1 %349 }
 0x134   : > { %541 = vst [vmem:[#allocation2 + $0x28] sm:$0xcc] %v537_v20  ;;  %585 = vst [vmem:[#allocation2 + $0x38] sm:$0x33] %v581_v41  ;;  %v621_v23 = vrot.slane %v618_v21, 4  ;;  %v353_v63 = vrot.slane %v350_v6, 4 }
 0x136   : > { %v625_v54 = vsel %vm354_vm0, %v620_v28, %v621_v23  ;;  %v358_v25 = vsel %vm354_vm0, %v352_v12, %v353_v63  ;;  %v1769_v12 = vsub.s32 2, %v2528_v3  ;;  %v1788_v3 = vld [vmem:[%s3074_s5] sm:$0xff] }
 0x137   : > { %v626_v24 = vsel %vm623_vm8, %v2946_v26, %v625_v54  ;;  %v359_v48 = vsel %vm356_vm9, %v348_v42, %v358_v25  ;;  %v395_v16 = vpop.permute.xlu0 %394  ;;  %v440_v27 = vpop.permute.xlu1 %439  ;;  %v2285_v17 = vld [vmem:[#allocation2 + $0x4] ss:$16 sps:$4 sm:$0xff]   ;;  %v2287_v30 = vld [vmem:[#allocation2] ss:$16 sps:$4 sm:$0xff]  }
 0x138   : > { %630 = vst [vmem:[#allocation2 + $0x38] sm:$0xcc] %v626_v24  ;;  %363 = vst [vmem:[#allocation2 + $0x8] sm:$0xcc] %v359_v48  ;;  %v398_v57 = vrot.slane %v395_v16, 4  ;;  %v443_v31 = vrot.slane %v440_v27, 4  ;;  %1689 = vmatprep.subr.bf16.mxu0 %v2285_v17 }
 0x139   : > { %1690 = vmatpush1.bf16.msra.mxu0 %v2287_v30  ;;  %v1965_v27 = vld [vmem:[%s3072_s3] sm:$0xff] }
 0x13a   : > { %v402_v19 = vsel %vm354_vm0, %v397_v38, %v398_v57  ;;  %v447_v28 = vsel %vm354_vm0, %v442_v0, %v443_v31  ;;  %2142 = vmatprep.subr.mxu0 %v2417_v22  ;;  %vm2418_vm0 = vmmov 0  }
 0x13b   : > { %v403_v13 = vsel %vm400_vm10, %v393_v5, %v402_v19  ;;  %v448_v26 = vsel %vm445_vm11, %v438_v56, %v447_v28  ;;  %v1770_v5 = vrot.slane %v1757_v44, %v1769_v12  ;;  %v1975_v28 = vld [vmem:[%s3073_s4] sm:$0xff] }
 0x13c   : > { %407 = vst [vmem:[#allocation2 + $0x18] sm:$0x33] %v403_v13  ;;  %452 = vst [vmem:[#allocation2 + $0x18] sm:$0xcc] %v448_v26  ;;  %1708 = vmatmul.mubr.bf16.vlgmr.msra.gmra.mxu0 %v1476_v33 }
 0x13d   : > { %2144 = vmatprep.mubr.msk.f32.mxu0 %vm2418_vm0, %v2417_v22 }
 0x13f   : > { %v2288_v35 = vld [vmem:[#allocation2 + $0x2c] ss:$16 sps:$4 sm:$0xff]   ;;  %v2290_v11 = vld [vmem:[#allocation2 + $0x28] ss:$16 sps:$4 sm:$0xff]  }
 0x140   : > { %1728 = vmatprep.subr.bf16.mxu1 %v2288_v35 }
 0x141   : > { %1729 = vmatpush1.bf16.msra.mxu1 %v2290_v11 }
 0x143   : > { %v2291_v36 = vld [vmem:[#allocation2 + $0xc] ss:$16 sps:$4 sm:$0xff]   ;;  %v2293_v55 = vld [vmem:[#allocation2 + $0x8] ss:$16 sps:$4 sm:$0xff]  }
 0x144   : > { %1730 = vmatprep.subr.bf16.mxu1 %v2291_v36  ;;  %v1513_v42 = vpop.permute.xlu0 %1512 }
 0x145   : > { %1731 = vmatpush1.bf16.msra.mxu1 %v2293_v55 }
 0x146   : > { %2147 = vmatprep.subr.mxu1 %v2417_v22 }
 0x148   : > { %1749 = vmatmul.mubr.bf16.vlgmr.msra.gmra.mxu1 %v1476_v33 }
 0x149   : > { %2149 = vmatprep.mubr.msk.f32.mxu1 %vm2418_vm0, %v2417_v22 }
 0x1fc   : > { %v1709_v58 = vpop.f32.mrf.mxu0 }
 0x1fd   : > { %v1710_v49 = vadd.f32 %v1709_v58, %v1513_v42 }
 0x1fe   : > { %v1711_v39 = vpop.f32.mrf.mxu0 }
 0x1ff   : > { %v1712_v32 = vadd.f32 %v1711_v39, %v1513_v42  ;;  %v1779_v4 = vmul.f32 %v1762_v47, %v1710_v49 }
 0x200   : > { %v1713_v34 = vpop.f32.mrf.mxu0 }
 0x201   : > { %v1780_v40 = vmul.f32 %v1766_v52, %v1712_v32 }
 0x202   : > { %v1714_v61 = vpop.f32.mrf.mxu0 }
 0x203   : > { %v1783_v62 = vadd.f32 %v1780_v40, %v1779_v4 }
 0x208   : > { %v1750_v38 = vpop.f32.mrf.mxu1 }
 0x209   : > { %v1751_v51 = vadd.f32 %v1750_v38, %v1513_v42 }
 0x20a   : > { %v1752_v56 = vpop.f32.mrf.mxu1 }
 0x20b   : > { %v1781_v59 = vmul.f32 %v1770_v5, %v1751_v51  ;;  %v1753_v60 = vadd.f32 %v1752_v56, %v1513_v42 }
 0x20c   : > { %v1754_v50 = vpop.f32.mrf.mxu1 }
 0x20d   : > { %v1782_v0 = vmul.f32 %v1774_v7, %v1753_v60  ;;  %v1784_v1 = vadd.f32 %v1783_v62, %v1781_v59 }
 0x20e   : > { %v1755_v46 = vpop.f32.mrf.mxu1 }
 0x20f   : > { %v1785_v2 = vadd.f32 %v1784_v1, %v1782_v0 }
 0x211   : > { %1786 = vadd.xlane.f32.xlu1 %v1785_v2 }
 0x29a   : > { %v1787_v8 = vpop.xlane.xlu1 %1786 }
 0x29b   : > { %2143 = vmatpush3.msra.mxu0 %v1787_v8 }
 0x29c   : > { %2145 = vmatmul.mubr.msk.f32.vlgmr.msra.gmra.mxu0 %vm979_vm15, %v1788_v3 }
 0x35c   : > { %v1859_v29 = vpop.f32.mrf.mxu0 }
 0x35d   : > { %1865 = vperm.xlu0 %2233, %v1859_v29  }
 0x35e   : > { %v2146_v9 = vpop.f32.mrf.mxu0 }
 0x3d8   : > { %v1866_v10 = vpop.permute.xlu0 %1865 }
 0x3d9   : > { %v1868_v14 = vsub.f32 %v1710_v49, %v1866_v10  ;;  %v1869_v37 = vsub.f32 %v1712_v32, %v1866_v10  ;;  %v1870_v15 = vsub.f32 %v1751_v51, %v1866_v10  ;;  %v1871_v18 = vsub.f32 %v1753_v60, %v1866_v10 }
 0x3db   : > { %v1872_v20 = vmul.f32 %v1868_v14, %v1868_v14  ;;  %v1873_v41 = vmul.f32 %v1869_v37, %v1869_v37  ;;  %v1874_v21 = vmul.f32 %v1870_v15, %v1870_v15  ;;  %v1875_v6 = vmul.f32 %v1871_v18, %v1871_v18 }
 0x3dd   : > { %v1876_v23 = vmul.f32 %v1872_v20, %v1762_v47  ;;  %v1877_v63 = vmul.f32 %v1873_v41, %v1766_v52  ;;  %v1878_v54 = vmul.f32 %v1874_v21, %v1770_v5  ;;  %v1879_v24 = vmul.f32 %v1875_v6, %v1774_v7 }
 0x3df   : > { %v1880_v25 = vadd.f32 %v1877_v63, %v1876_v23 }
 0x3e1   : > { %v1881_v48 = vadd.f32 %v1880_v25, %v1878_v54 }
 0x3e3   : > { %v1882_v16 = vadd.f32 %v1881_v48, %v1879_v24 }
 0x3e5   : > { %1883 = vadd.xlane.f32.xlu0 %v1882_v16 }
 0x3fb   : > { %1968 = vperm.xlu0 %2233, %v1965_v27  }
 0x46e   : > { %v1884_v17 = vpop.xlane.xlu0 %1883 }
 0x46f   : > { %2148 = vmatpush3.msra.mxu1 %v1884_v17 }
 0x470   : > { %2150 = vmatmul.mubr.msk.f32.vlgmr.msra.gmra.mxu1 %vm979_vm15, %v1788_v3 }
 0x476   : > { %v1969_v36 = vpop.permute.xlu0 %1968 }
 0x530   : > { %v1951_v30 = vpop.f32.mrf.mxu1 }
 0x531   : > { %v1952_v57 = vadd.f32 1e-05, %v1951_v30 }
 0x532   : > { %v2151_v31 = vpop.f32.mrf.mxu1 }
 0x533   : > { %2294 = vrsqrt.f32 %v1952_v57 }
 0x540   : > { %v2295_v19 = vpop.eup %2294 }
 0x541   : > { %1958 = vperm.xlu1 %2234, %v2295_v19  }
 0x545   : > { %1978 = vperm.xlu1 %2234, %v1975_v28  }
 0x5bc   : > { %v1959_v33 = vpop.permute.xlu1 %1958 }
 0x5bd   : > { %v1961_v13 = vmul.f32 %v1959_v33, %v1868_v14  ;;  %v1962_v26 = vmul.f32 %v1959_v33, %v1869_v37  ;;  %v1963_v35 = vmul.f32 %v1959_v33, %v1870_v15  ;;  %v1964_v11 = vmul.f32 %v1959_v33, %v1871_v18 }
 0x5bf   : > { %v1971_v55 = vmul.f32 %v1969_v36, %v1961_v13  ;;  %v1972_v22 = vmul.f32 %v1969_v36, %v1962_v26  ;;  %v1973_v58 = vmul.f32 %v1969_v36, %v1963_v35  ;;  %v1974_v39 = vmul.f32 %v1969_v36, %v1964_v11 }
 0x5c0   : > { %v1979_v43 = vpop.permute.xlu1 %1978 }
 0x5c1   : > { %v1981_v44 = vadd.f32 %v1979_v43, %v1971_v55  ;;  %v1982_v45 = vadd.f32 %v1979_v43, %v1972_v22  ;;  %v1983_v34 = vadd.f32 %v1979_v43, %v1973_v58  ;;  %v1984_v42 = vadd.f32 %v1979_v43, %v1974_v39 }
 0x5c3   : > { %1985 = vst [vmem:[%s284_s22] sm:$0xff] %v1981_v44  ;;  %1986 = vst [vmem:[%s284_s22 + $0x8] sm:$0xff] %v1982_v45 }
 0x5c4   : > { %1987 = vst [vmem:[%s284_s22 + $0x10] sm:$0xff] %v1983_v34  ;;  %1988 = vst [vmem:[%s284_s22 + $0x18] sm:$0xff] %v1984_v42 }
 0x5c5   : > { %2335 = shalt.err (!%p2332_p0)
}
 0x5c6   : > { %s2336_s17 = scalar_lea.hbm %s3028_s9, 512  ;;  %s2340_s20 = scalar_lea.hbm %s3076_s7, 1024 }
 0x5c7   : > { %p2337_p1 = scmp.ne.s32.totalorder %s3028_s9, %s2336_s17  ;;  %p2341_p4 = scmp.lt.s32.totalorder %s3028_s9, %s3076_s7 }
 0x5c8   : > { %p2342_p7 = scmp.lt.s32.totalorder %s2340_s20, %s2336_s17 }
 0x5c9   : > { %p2338_p2 = pnand %p2337_p1, %p2498_p5 }
 0x5ca   : > { %p2343_p8 = por %p2342_p7, %p2341_p4 }
 0x5cb   : > { %p2339_p3 = pneg %p2338_p2 }
 0x5cd   : > { %p2344_p6 = pnand %p2343_p8, %p2339_p3 }
 0x5cf   : > { %2347 = shalt.err (!%p2344_p6)
}
 0x5d0   : > { %2157 = dma.vmem_to_hbm [thread:$0]  (%p2498_p5), %s3030_s23, 512, %s3028_s9, %s1990_s28  }
 0x5d1 PF: > { %p2169_p9 = scmp.ge.s32.totalorder %s2386_s27, 2  ;;  %s2016_s29 = sand.u32 1, %s2374_s24  }
 0x5d2   : > { %p3080_p10 = scmp.ne.s32.totalorder %s3078_s12, 0  ;;  %s2017_s8 = scalar_lea.sflag [#allocation5], %s2016_s29 }
 0x5d4   : > { %p2164_p11 = pnand %p2169_p9, %p3080_p10 }
 0x5d6   : > { %p2165_p12 = pneg %p2164_p11 }
 0x5d8   : > { %2369 = dma.done.wait (%p2165_p12), %s2017_s8, 512  }
 0x5d9   : > { %2371 = vsyncadd (%p2165_p12), %s2017_s8, 4294966784  ;;  %p18_p13 = scmp.ge.s32.totalorder %s2485_s30, 4   ;;  %s3081_s24 = smov %s2378_s25 }
 0x5da   : > { %s3082_s25 = smov %s2382_s26  ;;  %s3083_s26 = smov %s2496_s10 }
 0x5db   : > { %s3084_s27 = smov %s2485_s30  ;;  %20 = sbr.rel (!%p18_p13) target bundleno = 4 (0x4), region = 88 }
 0x5e0   :  { %2022 = vsyncpa [#allocation4], 1 }
 0x5e1   :  { %2024 = vsyncpa [#allocation4 + $0x1], 1 }
 0x5e2   :  { %2025 = vsyncpa [#allocation5], 1 }
 0x5e3   :  { %2027 = vsyncpa [#allocation5 + $0x1], 1 }

</bundles_post_ra>
